<compile_context>
chip_gen: v6e
topology: v6e:2x2x1
jax: 0.10.0
libtpu: 0.0.40
codegen_flags: <defaults>
</compile_context>

<pallas_src>
import functools

import jax
import jax.numpy as jnp
from jax.experimental import pallas as pl
from jax.experimental.pallas import tpu as pltpu


def birnn_chunk_kernel(embf_ref,   # (TC*B, D) bf16  fwd-order chunk of time-major embeddings
                       embb_ref,   # (TC*B, D) bf16  bwd-order chunk (descending chunk index)
                       wihf_ref,   # (D, 4H)   bf16  fwd W_ih, gate cols [i|f|o|g], i/f/o pre-scaled 0.5
                       wihb_ref,   # (D, 4H)   bf16  bwd W_ih, same layout
                       bf_ref,     # (1, 4H)   f32   fwd b_ih+b_hh, same layout/scale
                       bb_ref,     # (1, 4H)   f32
                       whhf_ref,   # (H, 4H)   f32   fwd W_hh, same layout/scale
                       whhb_ref,   # (H, 4H)   f32
                       wout_ref,   # (1, 2H)   f32   [w_fwd | w_bwd]
                       bout_ref,   # (1, 1)    f32
                       out_ref,    # (B, 1)    f32   sigmoid probabilities
                       hf_ref, hb_ref, cf_ref, cb_ref,   # (B, H) f32 VMEM state scratch
                       *, TC, B, H):
    c = pl.program_id(0)

    @pl.when(c == 0)
    def _init():
        hf_ref[...] = jnp.zeros_like(hf_ref)
        hb_ref[...] = jnp.zeros_like(hb_ref)
        cf_ref[...] = jnp.zeros_like(cf_ref)
        cb_ref[...] = jnp.zeros_like(cb_ref)

    # Hoisted input projection for this chunk (both directions): bf16 MXU feed,
    # f32 accumulation, bias folded in once per chunk (not per step).
    gxf = jnp.dot(embf_ref[...], wihf_ref[...],
                  preferred_element_type=jnp.float32) + bf_ref[...]      # (TC*B, 4H)
    gxb = jnp.dot(embb_ref[...], wihb_ref[...],
                  preferred_element_type=jnp.float32) + bb_ref[...]      # (TC*B, 4H)

    whhf = whhf_ref[...]
    whhb = whhb_ref[...]
    h_f = hf_ref[...]
    h_b = hb_ref[...]
    c_f = cf_ref[...]
    c_b = cb_ref[...]

    # Serial recurrence over the chunk.  TC is small & static, so a static
    # Python loop keeps every slice index constant and gives the scheduler a
    # full cross-iteration view of the two independent (fwd/bwd) chains.
    # TODO(synk): at large TC switch to lax.fori_loop(unroll=4..8) reading gx
    # from a VMEM scratch ref via ref[pl.ds(pl.multiple_of(s*B, B), B), :].
    for s in range(TC):
        # fwd walks the chunk in ascending time, bwd in descending time.
        g_f = gxf[s * B:(s + 1) * B, :] + jnp.dot(
            h_f, whhf, preferred_element_type=jnp.float32)               # (B, 4H)
        g_b = gxb[(TC - 1 - s) * B:(TC - s) * B, :] + jnp.dot(
            h_b, whhb, preferred_element_type=jnp.float32)               # (B, 4H)
        # One tanh per direction covers ALL gates: the sigmoid gates (i|f|o)
        # were pre-scaled by 0.5 in the weights so sigmoid(x)=0.5*(tanh(x/2)+1);
        # the g column block is unscaled so tanh applies directly.
        t_f = jnp.tanh(g_f)
        t_b = jnp.tanh(g_b)
        c_f = (0.5 * (t_f[:, H:2 * H] + 1.0)) * c_f \
            + (0.5 * (t_f[:, 0:H] + 1.0)) * t_f[:, 3 * H:4 * H]
        c_b = (0.5 * (t_b[:, H:2 * H] + 1.0)) * c_b \
            + (0.5 * (t_b[:, 0:H] + 1.0)) * t_b[:, 3 * H:4 * H]
        h_f = (0.5 * (t_f[:, 2 * H:3 * H] + 1.0)) * jnp.tanh(c_f)
        h_b = (0.5 * (t_b[:, 2 * H:3 * H] + 1.0)) * jnp.tanh(c_b)

    hf_ref[...] = h_f
    hb_ref[...] = h_b
    cf_ref[...] = c_f
    cb_ref[...] = c_b

    # Final head on the last chunk: Linear(2H -> 1) as VPU multiply + lane
    # reduction (no N=1 MXU push), then sigmoid (off the serial loop).
    @pl.when(c == pl.num_programs(0) - 1)
    def _head():
        w = wout_ref[...]
        logits = (jnp.sum(h_f * w[:, 0:H], axis=-1, keepdims=True)
                  + jnp.sum(h_b * w[:, H:2 * H], axis=-1, keepdims=True)
                  + bout_ref[...])
        # TODO(synk): at large B emit the logits lane-dense as (1, B) to avoid
        # masked vst of a last-dim=1 output; irrelevant at B<=8.
        out_ref[...] = jax.nn.sigmoid(logits)


def _permute_gates_and_prescale(w, H):
    """PyTorch gate order [i|f|g|o] -> [i|f|o|g] along the last axis, with the
    sigmoid gates (i/f/o) pre-scaled by 0.5 so a single in-kernel tanh
    implements both the sigmoid and the tanh gates."""
    i = w[..., 0:H]
    f = w[..., H:2 * H]
    g = w[..., 2 * H:3 * H]
    o = w[..., 3 * H:4 * H]
    return jnp.concatenate([0.5 * i, 0.5 * f, 0.5 * o, g], axis=-1)


def fake_news_classifier_fwd(word_indices, params):
    """word_indices: (B, T) int32 token ids (word->index lookup done outside)."""
    B, T = word_indices.shape
    H = params['whh_f'].shape[0]
    D = params['embedding'].shape[1]

    # Pad the batch to a sublane multiple so every per-timestep row slice of
    # the time-major slab is (8,*)-aligned inside the kernel.
    Bp = max(8, -(-B // 8) * 8)
    idx = jnp.pad(word_indices, ((0, Bp - B), (0, 0)))       # extra rows = <PAD>=0

    # Embedding gather directly into time-major flattened (T*Bp, D) order, in
    # bf16 (halves the HBM->VMEM DMA bytes of the streamed slab); only the tiny
    # int32 index array is transposed, never the activations.
    flat_idx = jnp.reshape(jnp.transpose(idx), (-1,))                      # (T*Bp,)
    emb_tm = jnp.take(params['embedding'].astype(jnp.bfloat16), flat_idx, axis=0)

    # One-time parameter plumbing (pure glue, outside the kernel): permute gate
    # columns, fold the 0.5 sigmoid pre-scale into W_ih / W_hh / b, cast the
    # large input-projection weights to bf16 for the MXU.  W_hh stays f32: the
    # serial-path (B,H)@(H,4H) dot is tiny and latency-bound, not throughput-bound.
    wih_f = _permute_gates_and_prescale(params['wih_f'], H).astype(jnp.bfloat16)
    wih_b = _permute_gates_and_prescale(params['wih_b'], H).astype(jnp.bfloat16)
    b_f = _permute_gates_and_prescale(params['b_f'], H)
    b_b = _permute_gates_and_prescale(params['b_b'], H)
    whh_f = _permute_gates_and_prescale(params['whh_f'], H)
    whh_b = _permute_gates_and_prescale(params['whh_b'], H)
    wout_row = jnp.transpose(params['wout'])                               # (1, 2H)

    # T-chunk size: the grid streams the embedding slab chunk-by-chunk while
    # the state is carried in VMEM scratch.  At realistic (T,B,H) size the
    # chunk so that 2x double-buffered emb chunks + weights + state fit the
    # VMEM budget (<= ~48 MiB on v7x's 64 MiB VMEM; set vmem_limit_bytes then).
    TC = next(cand for cand in (8, 4, 2, 1) if T % cand == 0)
    num_chunks = T // TC

    kern = functools.partial(birnn_chunk_kernel, TC=TC, B=Bp, H=H)

    grid_spec = pltpu.PrefetchScalarGridSpec(
        num_scalar_prefetch=0,
        grid=(num_chunks,),
        in_specs=[
            # Two views of the same time-major slab: ascending chunk index for
            # the forward direction, descending for the backward direction.
            pl.BlockSpec((TC * Bp, D), lambda c: (c, 0)),
            pl.BlockSpec((TC * Bp, D), lambda c: (num_chunks - 1 - c, 0)),
            pl.BlockSpec((D, 4 * H), lambda c: (0, 0)),
            pl.BlockSpec((D, 4 * H), lambda c: (0, 0)),
            pl.BlockSpec((1, 4 * H), lambda c: (0, 0)),
            pl.BlockSpec((1, 4 * H), lambda c: (0, 0)),
            pl.BlockSpec((H, 4 * H), lambda c: (0, 0)),
            pl.BlockSpec((H, 4 * H), lambda c: (0, 0)),
            pl.BlockSpec((1, 2 * H), lambda c: (0, 0)),
            pl.BlockSpec((1, 1), lambda c: (0, 0)),
        ],
        out_specs=pl.BlockSpec((Bp, 1), lambda c: (0, 0)),
        scratch_shapes=[pltpu.VMEM((Bp, H), jnp.float32)] * 4,
    )

    out = pl.pallas_call(
        kern,
        out_shape=jax.ShapeDtypeStruct((Bp, 1), jnp.float32),
        grid_spec=grid_spec,
        compiler_params=pltpu.CompilerParams(
            dimension_semantics=("arbitrary",)),   # serial carry over T-chunks
    )(emb_tm, emb_tm, wih_f, wih_b, b_f, b_b, whh_f, whh_b, wout_row,
      params['bout'])
    return out[:B]


def reference_fwd(word_indices, params):
    """Pure-JAX reference of the same forward pass (for a correctness check)."""
    emb = jnp.take(params['embedding'], word_indices, axis=0)   # (B, T, D)
    B, T, _ = emb.shape
    H = params['whh_f'].shape[0]

    def run(seq, wih, whh, b):
        h = jnp.zeros((B, H), jnp.float32)
        c = jnp.zeros((B, H), jnp.float32)
        for t in range(T):
            x_t = seq[:, t, :]
            gates = x_t @ wih + h @ whh + b
            i = jax.nn.sigmoid(gates[:, :H])
            f = jax.nn.sigmoid(gates[:, H:2 * H])
            g = jnp.tanh(gates[:, 2 * H:3 * H])
            o = jax.nn.sigmoid(gates[:, 3 * H:])
            c = f * c + i * g
            h = o * jnp.tanh(c)
        return h

    h_f = run(emb, params['wih_f'], params['whh_f'], params['b_f'])
    h_b = run(emb[:, ::-1, :], params['wih_b'], params['whh_b'], params['b_b'])
    h_cat = jnp.concatenate([h_f, h_b], axis=1)
    return jax.nn.sigmoid(h_cat @ params['wout'] + params['bout'])


if __name__ == "__main__":
    # Small shapes consistent with the module's forward:
    #   B=2 sentences, T=8 tokens, GloVe dim D=16, hidden_size H=32, vocab V=12.
    B, T, D, H, V = 2, 8, 16, 32, 12

    keys = jax.random.split(jax.random.PRNGKey(0), 12)

    def uni(k, shape, bound):
        return jax.random.uniform(k, shape, jnp.float32, -bound, bound)

    def bf16_representable(x):
        # The kernel feeds the MXU in bf16 (perf item); storing the embedding
        # table / W_ih at bf16-representable values makes that cast exact so
        # the pure-f32 reference can be compared tightly.
        return x.astype(jnp.bfloat16).astype(jnp.float32)

    # Synthetic "GloVe" table: row 0 = <PAD> (zeros), row 1 = <UNK> (-1s),
    # matching load_glove_embeddings' insertion convention.
    emb_matrix = jax.random.normal(keys[0], (V, D), jnp.float32)
    emb_matrix = bf16_representable(emb_matrix.at[0].set(0.0).at[1].set(-1.0))

    k_lstm = 1.0 / float(jnp.sqrt(H))
    k_lin = 1.0 / float(jnp.sqrt(2 * H))
    params = dict(
        embedding=emb_matrix,
        # forward direction (weights stored transposed: (in, 4H), gate order i|f|g|o)
        wih_f=bf16_representable(uni(keys[1], (D, 4 * H), k_lstm)),
        whh_f=uni(keys[2], (H, 4 * H), k_lstm),
        b_f=uni(keys[3], (1, 4 * H), k_lstm) + uni(keys[4], (1, 4 * H), k_lstm),  # b_ih + b_hh
        # backward direction
        wih_b=bf16_representable(uni(keys[5], (D, 4 * H), k_lstm)),
        whh_b=uni(keys[6], (H, 4 * H), k_lstm),
        b_b=uni(keys[7], (1, 4 * H), k_lstm) + uni(keys[8], (1, 4 * H), k_lstm),
        # final_pred: Linear(2H -> 1), stored as (2H, 1)
        wout=uni(keys[9], (2 * H, 1), k_lin),
        bout=uni(keys[10], (1, 1), k_lin),
    )

    # TODO(synk): the python string->index dict lookup in forward() has no
    # kernel equivalent; we start directly from integer token ids.
    word_indices = jax.random.randint(jax.random.PRNGKey(42), (B, T), 0, V,
                                      dtype=jnp.int32)

    out = fake_news_classifier_fwd(word_indices, params)
    out = jax.block_until_ready(out)

    ref = reference_fwd(word_indices, params)
    assert out.shape == (B, 1)
    assert jnp.allclose(out, ref, atol=1e-4, rtol=1e-4), (out, ref)
    print("KERNEL_OK")
</pallas_src>

<mosaic_0001>
module attributes {stable_mosaic.version = 11 : i64} {
  func.func @birnn_chunk_kernel(%arg0: i32, %arg1: memref<64x16xbf16, #tpu.memory_space<vmem>>, %arg2: memref<64x16xbf16, #tpu.memory_space<vmem>>, %arg3: memref<16x128xbf16, #tpu.memory_space<vmem>>, %arg4: memref<16x128xbf16, #tpu.memory_space<vmem>>, %arg5: memref<1x128xf32, #tpu.memory_space<vmem>>, %arg6: memref<1x128xf32, #tpu.memory_space<vmem>>, %arg7: memref<32x128xf32, #tpu.memory_space<vmem>>, %arg8: memref<32x128xf32, #tpu.memory_space<vmem>>, %arg9: memref<1x64xf32, #tpu.memory_space<vmem>>, %arg10: memref<1x1xf32, #tpu.memory_space<vmem>>, %arg11: memref<8x1xf32, #tpu.memory_space<vmem>>, %arg12: memref<8x32xf32, #tpu.memory_space<vmem>>, %arg13: memref<8x32xf32, #tpu.memory_space<vmem>>, %arg14: memref<8x32xf32, #tpu.memory_space<vmem>>, %arg15: memref<8x32xf32, #tpu.memory_space<vmem>>) attributes {dimension_semantics = [#tpu.dimension_semantics<arbitrary>], iteration_bounds = array<i64: 1>, scalar_prefetch = 0 : i64, scratch_operands = 4 : i64, tpu.core_type = #tpu.core_type<tc>, window_params = [{transform_indices = @transform_0, window_bounds = array<i64: 64, 16>}, {transform_indices = @transform_1, window_bounds = array<i64: 64, 16>}, {pipeline_mode = #tpu.pipeline_mode<synchronous>, transform_indices = @transform_2, window_bounds = array<i64: 16, 128>}, {pipeline_mode = #tpu.pipeline_mode<synchronous>, transform_indices = @transform_3, window_bounds = array<i64: 16, 128>}, {pipeline_mode = #tpu.pipeline_mode<synchronous>, transform_indices = @transform_4, window_bounds = array<i64: 1, 128>}, {pipeline_mode = #tpu.pipeline_mode<synchronous>, transform_indices = @transform_5, window_bounds = array<i64: 1, 128>}, {pipeline_mode = #tpu.pipeline_mode<synchronous>, transform_indices = @transform_6, window_bounds = array<i64: 32, 128>}, {pipeline_mode = #tpu.pipeline_mode<synchronous>, transform_indices = @transform_7, window_bounds = array<i64: 32, 128>}, {pipeline_mode = #tpu.pipeline_mode<synchronous>, transform_indices = @transform_8, window_bounds = array<i64: 1, 64>}, {pipeline_mode = #tpu.pipeline_mode<synchronous>, transform_indices = @transform_9, window_bounds = array<i64: 1, 1>}, {pipeline_mode = #tpu.pipeline_mode<synchronous>, transform_indices = @transform_10, window_bounds = array<i64: 8, 1>}]} {
    %c0_i32 = arith.constant 0 : i32
    %0 = arith.cmpi eq, %arg0, %c0_i32 : i32
    %1 = arith.extui %0 : i1 to i32
    %c0_i32_0 = arith.constant 0 : i32
    %2 = arith.cmpi ne, %1, %c0_i32_0 : i32
    scf.if %2 {
      %cst_147 = arith.constant 0.000000e+00 : f32
      %428 = vector.broadcast %cst_147 : f32 to vector<8x32xf32>
      %c0_148 = arith.constant 0 : index
      %c0_149 = arith.constant 0 : index
      %429 = vector.load %arg12[%c0_148, %c0_149] : memref<8x32xf32, #tpu.memory_space<vmem>>, vector<8x32xf32>
      tpu.vector_store %arg12[%c0_148, %c0_149], %428 {strides = array<i32>} : memref<8x32xf32, #tpu.memory_space<vmem>>, vector<8x32xf32>,
      %cst_150 = arith.constant 0.000000e+00 : f32
      %430 = vector.broadcast %cst_150 : f32 to vector<8x32xf32>
      %c0_151 = arith.constant 0 : index
      %c0_152 = arith.constant 0 : index
      %431 = vector.load %arg13[%c0_151, %c0_152] : memref<8x32xf32, #tpu.memory_space<vmem>>, vector<8x32xf32>
      tpu.vector_store %arg13[%c0_151, %c0_152], %430 {strides = array<i32>} : memref<8x32xf32, #tpu.memory_space<vmem>>, vector<8x32xf32>,
      %cst_153 = arith.constant 0.000000e+00 : f32
      %432 = vector.broadcast %cst_153 : f32 to vector<8x32xf32>
      %c0_154 = arith.constant 0 : index
      %c0_155 = arith.constant 0 : index
      %433 = vector.load %arg14[%c0_154, %c0_155] : memref<8x32xf32, #tpu.memory_space<vmem>>, vector<8x32xf32>
      tpu.vector_store %arg14[%c0_154, %c0_155], %432 {strides = array<i32>} : memref<8x32xf32, #tpu.memory_space<vmem>>, vector<8x32xf32>,
      %cst_156 = arith.constant 0.000000e+00 : f32
      %434 = vector.broadcast %cst_156 : f32 to vector<8x32xf32>
      %c0_157 = arith.constant 0 : index
      %c0_158 = arith.constant 0 : index
      %435 = vector.load %arg15[%c0_157, %c0_158] : memref<8x32xf32, #tpu.memory_space<vmem>>, vector<8x32xf32>
      tpu.vector_store %arg15[%c0_157, %c0_158], %434 {strides = array<i32>} : memref<8x32xf32, #tpu.memory_space<vmem>>, vector<8x32xf32>,
    } else {
    }
    %c0 = arith.constant 0 : index
    %c0_1 = arith.constant 0 : index
    %3 = vector.load %arg1[%c0, %c0_1] : memref<64x16xbf16, #tpu.memory_space<vmem>>, vector<64x16xbf16>
    %c0_2 = arith.constant 0 : index
    %c0_3 = arith.constant 0 : index
    %4 = vector.load %arg3[%c0_2, %c0_3] : memref<16x128xbf16, #tpu.memory_space<vmem>>, vector<16x128xbf16>
    %cst = arith.constant dense<0.000000e+00> : vector<64x128xf32>
    %5 = tpu.matmul %3, %4, %cst {dimension_numbers = #tpu.dot_dimension_numbers<[1], [0], [0], [1], [0, 0, 1, 1], [], []>} : vector<64x16xbf16>, vector<16x128xbf16>, vector<64x128xf32> -> vector<64x128xf32>
    %c0_4 = arith.constant 0 : index
    %c0_5 = arith.constant 0 : index
    %6 = vector.load %arg5[%c0_4, %c0_5] : memref<1x128xf32, #tpu.memory_space<vmem>>, vector<1x128xf32>
    %7 = vector.broadcast %6 : vector<1x128xf32> to vector<64x128xf32>
    %8 = arith.addf %5, %7 : vector<64x128xf32>
    %c0_6 = arith.constant 0 : index
    %c0_7 = arith.constant 0 : index
    %9 = vector.load %arg2[%c0_6, %c0_7] : memref<64x16xbf16, #tpu.memory_space<vmem>>, vector<64x16xbf16>
    %c0_8 = arith.constant 0 : index
    %c0_9 = arith.constant 0 : index
    %10 = vector.load %arg4[%c0_8, %c0_9] : memref<16x128xbf16, #tpu.memory_space<vmem>>, vector<16x128xbf16>
    %cst_10 = arith.constant dense<0.000000e+00> : vector<64x128xf32>
    %11 = tpu.matmul %9, %10, %cst_10 {dimension_numbers = #tpu.dot_dimension_numbers<[1], [0], [0], [1], [0, 0, 1, 1], [], []>} : vector<64x16xbf16>, vector<16x128xbf16>, vector<64x128xf32> -> vector<64x128xf32>
    %c0_11 = arith.constant 0 : index
    %c0_12 = arith.constant 0 : index
    %12 = vector.load %arg6[%c0_11, %c0_12] : memref<1x128xf32, #tpu.memory_space<vmem>>, vector<1x128xf32>
    %13 = vector.broadcast %12 : vector<1x128xf32> to vector<64x128xf32>
    %14 = arith.addf %11, %13 : vector<64x128xf32>
    %c0_13 = arith.constant 0 : index
    %c0_14 = arith.constant 0 : index
    %15 = vector.load %arg7[%c0_13, %c0_14] : memref<32x128xf32, #tpu.memory_space<vmem>>, vector<32x128xf32>
    %c0_15 = arith.constant 0 : index
    %c0_16 = arith.constant 0 : index
    %16 = vector.load %arg8[%c0_15, %c0_16] : memref<32x128xf32, #tpu.memory_space<vmem>>, vector<32x128xf32>
    %c0_17 = arith.constant 0 : index
    %c0_18 = arith.constant 0 : index
    %17 = vector.load %arg12[%c0_17, %c0_18] : memref<8x32xf32, #tpu.memory_space<vmem>>, vector<8x32xf32>
    %c0_19 = arith.constant 0 : index
    %c0_20 = arith.constant 0 : index
    %18 = vector.load %arg13[%c0_19, %c0_20] : memref<8x32xf32, #tpu.memory_space<vmem>>, vector<8x32xf32>
    %c0_21 = arith.constant 0 : index
    %c0_22 = arith.constant 0 : index
    %19 = vector.load %arg14[%c0_21, %c0_22] : memref<8x32xf32, #tpu.memory_space<vmem>>, vector<8x32xf32>
    %c0_23 = arith.constant 0 : index
    %c0_24 = arith.constant 0 : index
    %20 = vector.load %arg15[%c0_23, %c0_24] : memref<8x32xf32, #tpu.memory_space<vmem>>, vector<8x32xf32>
    %21 = vector.extract_strided_slice %8 {offsets = [0, 0], sizes = [8, 128], strides = [1, 1]} : vector<64x128xf32> to vector<8x128xf32>
    %cst_25 = arith.constant dense<0.000000e+00> : vector<8x128xf32>
    %22 = tpu.matmul %17, %15, %cst_25 {dimension_numbers = #tpu.dot_dimension_numbers<[1], [0], [0], [1], [0, 0, 1, 1], [], []>} : vector<8x32xf32>, vector<32x128xf32>, vector<8x128xf32> -> vector<8x128xf32>
    %23 = arith.addf %21, %22 : vector<8x128xf32>
    %24 = vector.extract_strided_slice %14 {offsets = [56, 0], sizes = [8, 128], strides = [1, 1]} : vector<64x128xf32> to vector<8x128xf32>
    %cst_26 = arith.constant dense<0.000000e+00> : vector<8x128xf32>
    %25 = tpu.matmul %18, %16, %cst_26 {dimension_numbers = #tpu.dot_dimension_numbers<[1], [0], [0], [1], [0, 0, 1, 1], [], []>} : vector<8x32xf32>, vector<32x128xf32>, vector<8x128xf32> -> vector<8x128xf32>
    %26 = arith.addf %24, %25 : vector<8x128xf32>
    %27 = math.tanh %23 : vector<8x128xf32>
    %28 = math.tanh %26 : vector<8x128xf32>
    %29 = vector.extract_strided_slice %27 {offsets = [0, 32], sizes = [8, 32], strides = [1, 1]} : vector<8x128xf32> to vector<8x32xf32>
    %cst_27 = arith.constant 1.000000e+00 : f32
    %30 = vector.broadcast %cst_27 : f32 to vector<8x32xf32>
    %31 = arith.addf %29, %30 : vector<8x32xf32>
    %cst_28 = arith.constant 5.000000e-01 : f32
    %32 = vector.broadcast %cst_28 : f32 to vector<8x32xf32>
    %33 = arith.mulf %32, %31 : vector<8x32xf32>
    %34 = arith.mulf %33, %19 : vector<8x32xf32>
    %35 = vector.extract_strided_slice %27 {offsets = [0, 0], sizes = [8, 32], strides = [1, 1]} : vector<8x128xf32> to vector<8x32xf32>
    %cst_29 = arith.constant 1.000000e+00 : f32
    %36 = vector.broadcast %cst_29 : f32 to vector<8x32xf32>
    %37 = arith.addf %35, %36 : vector<8x32xf32>
    %cst_30 = arith.constant 5.000000e-01 : f32
    %38 = vector.broadcast %cst_30 : f32 to vector<8x32xf32>
    %39 = arith.mulf %38, %37 : vector<8x32xf32>
    %40 = vector.extract_strided_slice %27 {offsets = [0, 96], sizes = [8, 32], strides = [1, 1]} : vector<8x128xf32> to vector<8x32xf32>
    %41 = arith.mulf %39, %40 : vector<8x32xf32>
    %42 = arith.addf %34, %41 : vector<8x32xf32>
    %43 = vector.extract_strided_slice %28 {offsets = [0, 32], sizes = [8, 32], strides = [1, 1]} : vector<8x128xf32> to vector<8x32xf32>
    %cst_31 = arith.constant 1.000000e+00 : f32
    %44 = vector.broadcast %cst_31 : f32 to vector<8x32xf32>
    %45 = arith.addf %43, %44 : vector<8x32xf32>
    %cst_32 = arith.constant 5.000000e-01 : f32
    %46 = vector.broadcast %cst_32 : f32 to vector<8x32xf32>
    %47 = arith.mulf %46, %45 : vector<8x32xf32>
    %48 = arith.mulf %47, %20 : vector<8x32xf32>
    %49 = vector.extract_strided_slice %28 {offsets = [0, 0], sizes = [8, 32], strides = [1, 1]} : vector<8x128xf32> to vector<8x32xf32>
    %cst_33 = arith.constant 1.000000e+00 : f32
    %50 = vector.broadcast %cst_33 : f32 to vector<8x32xf32>
    %51 = arith.addf %49, %50 : vector<8x32xf32>
    %cst_34 = arith.constant 5.000000e-01 : f32
    %52 = vector.broadcast %cst_34 : f32 to vector<8x32xf32>
    %53 = arith.mulf %52, %51 : vector<8x32xf32>
    %54 = vector.extract_strided_slice %28 {offsets = [0, 96], sizes = [8, 32], strides = [1, 1]} : vector<8x128xf32> to vector<8x32xf32>
    %55 = arith.mulf %53, %54 : vector<8x32xf32>
    %56 = arith.addf %48, %55 : vector<8x32xf32>
    %57 = vector.extract_strided_slice %27 {offsets = [0, 64], sizes = [8, 32], strides = [1, 1]} : vector<8x128xf32> to vector<8x32xf32>
    %cst_35 = arith.constant 1.000000e+00 : f32
    %58 = vector.broadcast %cst_35 : f32 to vector<8x32xf32>
    %59 = arith.addf %57, %58 : vector<8x32xf32>
    %cst_36 = arith.constant 5.000000e-01 : f32
    %60 = vector.broadcast %cst_36 : f32 to vector<8x32xf32>
    %61 = arith.mulf %60, %59 : vector<8x32xf32>
    %62 = math.tanh %42 : vector<8x32xf32>
    %63 = arith.mulf %61, %62 : vector<8x32xf32>
    %64 = vector.extract_strided_slice %28 {offsets = [0, 64], sizes = [8, 32], strides = [1, 1]} : vector<8x128xf32> to vector<8x32xf32>
    %cst_37 = arith.constant 1.000000e+00 : f32
    %65 = vector.broadcast %cst_37 : f32 to vector<8x32xf32>
    %66 = arith.addf %64, %65 : vector<8x32xf32>
    %cst_38 = arith.constant 5.000000e-01 : f32
    %67 = vector.broadcast %cst_38 : f32 to vector<8x32xf32>
    %68 = arith.mulf %67, %66 : vector<8x32xf32>
    %69 = math.tanh %56 : vector<8x32xf32>
    %70 = arith.mulf %68, %69 : vector<8x32xf32>
    %71 = vector.extract_strided_slice %8 {offsets = [8, 0], sizes = [8, 128], strides = [1, 1]} : vector<64x128xf32> to vector<8x128xf32>
    %cst_39 = arith.constant dense<0.000000e+00> : vector<8x128xf32>
    %72 = tpu.matmul %63, %15, %cst_39 {dimension_numbers = #tpu.dot_dimension_numbers<[1], [0], [0], [1], [0, 0, 1, 1], [], []>} : vector<8x32xf32>, vector<32x128xf32>, vector<8x128xf32> -> vector<8x128xf32>
    %73 = arith.addf %71, %72 : vector<8x128xf32>
    %74 = vector.extract_strided_slice %14 {offsets = [48, 0], sizes = [8, 128], strides = [1, 1]} : vector<64x128xf32> to vector<8x128xf32>
    %cst_40 = arith.constant dense<0.000000e+00> : vector<8x128xf32>
    %75 = tpu.matmul %70, %16, %cst_40 {dimension_numbers = #tpu.dot_dimension_numbers<[1], [0], [0], [1], [0, 0, 1, 1], [], []>} : vector<8x32xf32>, vector<32x128xf32>, vector<8x128xf32> -> vector<8x128xf32>
    %76 = arith.addf %74, %75 : vector<8x128xf32>
    %77 = math.tanh %73 : vector<8x128xf32>
    %78 = math.tanh %76 : vector<8x128xf32>
    %79 = vector.extract_strided_slice %77 {offsets = [0, 32], sizes = [8, 32], strides = [1, 1]} : vector<8x128xf32> to vector<8x32xf32>
    %cst_41 = arith.constant 1.000000e+00 : f32
    %80 = vector.broadcast %cst_41 : f32 to vector<8x32xf32>
    %81 = arith.addf %79, %80 : vector<8x32xf32>
    %cst_42 = arith.constant 5.000000e-01 : f32
    %82 = vector.broadcast %cst_42 : f32 to vector<8x32xf32>
    %83 = arith.mulf %82, %81 : vector<8x32xf32>
    %84 = arith.mulf %83, %42 : vector<8x32xf32>
    %85 = vector.extract_strided_slice %77 {offsets = [0, 0], sizes = [8, 32], strides = [1, 1]} : vector<8x128xf32> to vector<8x32xf32>
    %cst_43 = arith.constant 1.000000e+00 : f32
    %86 = vector.broadcast %cst_43 : f32 to vector<8x32xf32>
    %87 = arith.addf %85, %86 : vector<8x32xf32>
    %cst_44 = arith.constant 5.000000e-01 : f32
    %88 = vector.broadcast %cst_44 : f32 to vector<8x32xf32>
    %89 = arith.mulf %88, %87 : vector<8x32xf32>
    %90 = vector.extract_strided_slice %77 {offsets = [0, 96], sizes = [8, 32], strides = [1, 1]} : vector<8x128xf32> to vector<8x32xf32>
    %91 = arith.mulf %89, %90 : vector<8x32xf32>
    %92 = arith.addf %84, %91 : vector<8x32xf32>
    %93 = vector.extract_strided_slice %78 {offsets = [0, 32], sizes = [8, 32], strides = [1, 1]} : vector<8x128xf32> to vector<8x32xf32>
    %cst_45 = arith.constant 1.000000e+00 : f32
    %94 = vector.broadcast %cst_45 : f32 to vector<8x32xf32>
    %95 = arith.addf %93, %94 : vector<8x32xf32>
    %cst_46 = arith.constant 5.000000e-01 : f32
    %96 = vector.broadcast %cst_46 : f32 to vector<8x32xf32>
    %97 = arith.mulf %96, %95 : vector<8x32xf32>
    %98 = arith.mulf %97, %56 : vector<8x32xf32>
    %99 = vector.extract_strided_slice %78 {offsets = [0, 0], sizes = [8, 32], strides = [1, 1]} : vector<8x128xf32> to vector<8x32xf32>
    %cst_47 = arith.constant 1.000000e+00 : f32
    %100 = vector.broadcast %cst_47 : f32 to vector<8x32xf32>
    %101 = arith.addf %99, %100 : vector<8x32xf32>
    %cst_48 = arith.constant 5.000000e-01 : f32
    %102 = vector.broadcast %cst_48 : f32 to vector<8x32xf32>
    %103 = arith.mulf %102, %101 : vector<8x32xf32>
    %104 = vector.extract_strided_slice %78 {offsets = [0, 96], sizes = [8, 32], strides = [1, 1]} : vector<8x128xf32> to vector<8x32xf32>
    %105 = arith.mulf %103, %104 : vector<8x32xf32>
    %106 = arith.addf %98, %105 : vector<8x32xf32>
    %107 = vector.extract_strided_slice %77 {offsets = [0, 64], sizes = [8, 32], strides = [1, 1]} : vector<8x128xf32> to vector<8x32xf32>
    %cst_49 = arith.constant 1.000000e+00 : f32
    %108 = vector.broadcast %cst_49 : f32 to vector<8x32xf32>
    %109 = arith.addf %107, %108 : vector<8x32xf32>
    %cst_50 = arith.constant 5.000000e-01 : f32
    %110 = vector.broadcast %cst_50 : f32 to vector<8x32xf32>
    %111 = arith.mulf %110, %109 : vector<8x32xf32>
    %112 = math.tanh %92 : vector<8x32xf32>
    %113 = arith.mulf %111, %112 : vector<8x32xf32>
    %114 = vector.extract_strided_slice %78 {offsets = [0, 64], sizes = [8, 32], strides = [1, 1]} : vector<8x128xf32> to vector<8x32xf32>
    %cst_51 = arith.constant 1.000000e+00 : f32
    %115 = vector.broadcast %cst_51 : f32 to vector<8x32xf32>
    %116 = arith.addf %114, %115 : vector<8x32xf32>
    %cst_52 = arith.constant 5.000000e-01 : f32
    %117 = vector.broadcast %cst_52 : f32 to vector<8x32xf32>
    %118 = arith.mulf %117, %116 : vector<8x32xf32>
    %119 = math.tanh %106 : vector<8x32xf32>
    %120 = arith.mulf %118, %119 : vector<8x32xf32>
    %121 = vector.extract_strided_slice %8 {offsets = [16, 0], sizes = [8, 128], strides = [1, 1]} : vector<64x128xf32> to vector<8x128xf32>
    %cst_53 = arith.constant dense<0.000000e+00> : vector<8x128xf32>
    %122 = tpu.matmul %113, %15, %cst_53 {dimension_numbers = #tpu.dot_dimension_numbers<[1], [0], [0], [1], [0, 0, 1, 1], [], []>} : vector<8x32xf32>, vector<32x128xf32>, vector<8x128xf32> -> vector<8x128xf32>
    %123 = arith.addf %121, %122 : vector<8x128xf32>
    %124 = vector.extract_strided_slice %14 {offsets = [40, 0], sizes = [8, 128], strides = [1, 1]} : vector<64x128xf32> to vector<8x128xf32>
    %cst_54 = arith.constant dense<0.000000e+00> : vector<8x128xf32>
    %125 = tpu.matmul %120, %16, %cst_54 {dimension_numbers = #tpu.dot_dimension_numbers<[1], [0], [0], [1], [0, 0, 1, 1], [], []>} : vector<8x32xf32>, vector<32x128xf32>, vector<8x128xf32> -> vector<8x128xf32>
    %126 = arith.addf %124, %125 : vector<8x128xf32>
    %127 = math.tanh %123 : vector<8x128xf32>
    %128 = math.tanh %126 : vector<8x128xf32>
    %129 = vector.extract_strided_slice %127 {offsets = [0, 32], sizes = [8, 32], strides = [1, 1]} : vector<8x128xf32> to vector<8x32xf32>
    %cst_55 = arith.constant 1.000000e+00 : f32
    %130 = vector.broadcast %cst_55 : f32 to vector<8x32xf32>
    %131 = arith.addf %129, %130 : vector<8x32xf32>
    %cst_56 = arith.constant 5.000000e-01 : f32
    %132 = vector.broadcast %cst_56 : f32 to vector<8x32xf32>
    %133 = arith.mulf %132, %131 : vector<8x32xf32>
    %134 = arith.mulf %133, %92 : vector<8x32xf32>
    %135 = vector.extract_strided_slice %127 {offsets = [0, 0], sizes = [8, 32], strides = [1, 1]} : vector<8x128xf32> to vector<8x32xf32>
    %cst_57 = arith.constant 1.000000e+00 : f32
    %136 = vector.broadcast %cst_57 : f32 to vector<8x32xf32>
    %137 = arith.addf %135, %136 : vector<8x32xf32>
    %cst_58 = arith.constant 5.000000e-01 : f32
    %138 = vector.broadcast %cst_58 : f32 to vector<8x32xf32>
    %139 = arith.mulf %138, %137 : vector<8x32xf32>
    %140 = vector.extract_strided_slice %127 {offsets = [0, 96], sizes = [8, 32], strides = [1, 1]} : vector<8x128xf32> to vector<8x32xf32>
    %141 = arith.mulf %139, %140 : vector<8x32xf32>
    %142 = arith.addf %134, %141 : vector<8x32xf32>
    %143 = vector.extract_strided_slice %128 {offsets = [0, 32], sizes = [8, 32], strides = [1, 1]} : vector<8x128xf32> to vector<8x32xf32>
    %cst_59 = arith.constant 1.000000e+00 : f32
    %144 = vector.broadcast %cst_59 : f32 to vector<8x32xf32>
    %145 = arith.addf %143, %144 : vector<8x32xf32>
    %cst_60 = arith.constant 5.000000e-01 : f32
    %146 = vector.broadcast %cst_60 : f32 to vector<8x32xf32>
    %147 = arith.mulf %146, %145 : vector<8x32xf32>
    %148 = arith.mulf %147, %106 : vector<8x32xf32>
    %149 = vector.extract_strided_slice %128 {offsets = [0, 0], sizes = [8, 32], strides = [1, 1]} : vector<8x128xf32> to vector<8x32xf32>
    %cst_61 = arith.constant 1.000000e+00 : f32
    %150 = vector.broadcast %cst_61 : f32 to vector<8x32xf32>
    %151 = arith.addf %149, %150 : vector<8x32xf32>
    %cst_62 = arith.constant 5.000000e-01 : f32
    %152 = vector.broadcast %cst_62 : f32 to vector<8x32xf32>
    %153 = arith.mulf %152, %151 : vector<8x32xf32>
    %154 = vector.extract_strided_slice %128 {offsets = [0, 96], sizes = [8, 32], strides = [1, 1]} : vector<8x128xf32> to vector<8x32xf32>
    %155 = arith.mulf %153, %154 : vector<8x32xf32>
    %156 = arith.addf %148, %155 : vector<8x32xf32>
    %157 = vector.extract_strided_slice %127 {offsets = [0, 64], sizes = [8, 32], strides = [1, 1]} : vector<8x128xf32> to vector<8x32xf32>
    %cst_63 = arith.constant 1.000000e+00 : f32
    %158 = vector.broadcast %cst_63 : f32 to vector<8x32xf32>
    %159 = arith.addf %157, %158 : vector<8x32xf32>
    %cst_64 = arith.constant 5.000000e-01 : f32
    %160 = vector.broadcast %cst_64 : f32 to vector<8x32xf32>
    %161 = arith.mulf %160, %159 : vector<8x32xf32>
    %162 = math.tanh %142 : vector<8x32xf32>
    %163 = arith.mulf %161, %162 : vector<8x32xf32>
    %164 = vector.extract_strided_slice %128 {offsets = [0, 64], sizes = [8, 32], strides = [1, 1]} : vector<8x128xf32> to vector<8x32xf32>
    %cst_65 = arith.constant 1.000000e+00 : f32
    %165 = vector.broadcast %cst_65 : f32 to vector<8x32xf32>
    %166 = arith.addf %164, %165 : vector<8x32xf32>
    %cst_66 = arith.constant 5.000000e-01 : f32
    %167 = vector.broadcast %cst_66 : f32 to vector<8x32xf32>
    %168 = arith.mulf %167, %166 : vector<8x32xf32>
    %169 = math.tanh %156 : vector<8x32xf32>
    %170 = arith.mulf %168, %169 : vector<8x32xf32>
    %171 = vector.extract_strided_slice %8 {offsets = [24, 0], sizes = [8, 128], strides = [1, 1]} : vector<64x128xf32> to vector<8x128xf32>
    %cst_67 = arith.constant dense<0.000000e+00> : vector<8x128xf32>
    %172 = tpu.matmul %163, %15, %cst_67 {dimension_numbers = #tpu.dot_dimension_numbers<[1], [0], [0], [1], [0, 0, 1, 1], [], []>} : vector<8x32xf32>, vector<32x128xf32>, vector<8x128xf32> -> vector<8x128xf32>
    %173 = arith.addf %171, %172 : vector<8x128xf32>
    %174 = vector.extract_strided_slice %14 {offsets = [32, 0], sizes = [8, 128], strides = [1, 1]} : vector<64x128xf32> to vector<8x128xf32>
    %cst_68 = arith.constant dense<0.000000e+00> : vector<8x128xf32>
    %175 = tpu.matmul %170, %16, %cst_68 {dimension_numbers = #tpu.dot_dimension_numbers<[1], [0], [0], [1], [0, 0, 1, 1], [], []>} : vector<8x32xf32>, vector<32x128xf32>, vector<8x128xf32> -> vector<8x128xf32>
    %176 = arith.addf %174, %175 : vector<8x128xf32>
    %177 = math.tanh %173 : vector<8x128xf32>
    %178 = math.tanh %176 : vector<8x128xf32>
    %179 = vector.extract_strided_slice %177 {offsets = [0, 32], sizes = [8, 32], strides = [1, 1]} : vector<8x128xf32> to vector<8x32xf32>
    %cst_69 = arith.constant 1.000000e+00 : f32
    %180 = vector.broadcast %cst_69 : f32 to vector<8x32xf32>
    %181 = arith.addf %179, %180 : vector<8x32xf32>
    %cst_70 = arith.constant 5.000000e-01 : f32
    %182 = vector.broadcast %cst_70 : f32 to vector<8x32xf32>
    %183 = arith.mulf %182, %181 : vector<8x32xf32>
    %184 = arith.mulf %183, %142 : vector<8x32xf32>
    %185 = vector.extract_strided_slice %177 {offsets = [0, 0], sizes = [8, 32], strides = [1, 1]} : vector<8x128xf32> to vector<8x32xf32>
    %cst_71 = arith.constant 1.000000e+00 : f32
    %186 = vector.broadcast %cst_71 : f32 to vector<8x32xf32>
    %187 = arith.addf %185, %186 : vector<8x32xf32>
    %cst_72 = arith.constant 5.000000e-01 : f32
    %188 = vector.broadcast %cst_72 : f32 to vector<8x32xf32>
    %189 = arith.mulf %188, %187 : vector<8x32xf32>
    %190 = vector.extract_strided_slice %177 {offsets = [0, 96], sizes = [8, 32], strides = [1, 1]} : vector<8x128xf32> to vector<8x32xf32>
    %191 = arith.mulf %189, %190 : vector<8x32xf32>
    %192 = arith.addf %184, %191 : vector<8x32xf32>
    %193 = vector.extract_strided_slice %178 {offsets = [0, 32], sizes = [8, 32], strides = [1, 1]} : vector<8x128xf32> to vector<8x32xf32>
    %cst_73 = arith.constant 1.000000e+00 : f32
    %194 = vector.broadcast %cst_73 : f32 to vector<8x32xf32>
    %195 = arith.addf %193, %194 : vector<8x32xf32>
    %cst_74 = arith.constant 5.000000e-01 : f32
    %196 = vector.broadcast %cst_74 : f32 to vector<8x32xf32>
    %197 = arith.mulf %196, %195 : vector<8x32xf32>
    %198 = arith.mulf %197, %156 : vector<8x32xf32>
    %199 = vector.extract_strided_slice %178 {offsets = [0, 0], sizes = [8, 32], strides = [1, 1]} : vector<8x128xf32> to vector<8x32xf32>
    %cst_75 = arith.constant 1.000000e+00 : f32
    %200 = vector.broadcast %cst_75 : f32 to vector<8x32xf32>
    %201 = arith.addf %199, %200 : vector<8x32xf32>
    %cst_76 = arith.constant 5.000000e-01 : f32
    %202 = vector.broadcast %cst_76 : f32 to vector<8x32xf32>
    %203 = arith.mulf %202, %201 : vector<8x32xf32>
    %204 = vector.extract_strided_slice %178 {offsets = [0, 96], sizes = [8, 32], strides = [1, 1]} : vector<8x128xf32> to vector<8x32xf32>
    %205 = arith.mulf %203, %204 : vector<8x32xf32>
    %206 = arith.addf %198, %205 : vector<8x32xf32>
    %207 = vector.extract_strided_slice %177 {offsets = [0, 64], sizes = [8, 32], strides = [1, 1]} : vector<8x128xf32> to vector<8x32xf32>
    %cst_77 = arith.constant 1.000000e+00 : f32
    %208 = vector.broadcast %cst_77 : f32 to vector<8x32xf32>
    %209 = arith.addf %207, %208 : vector<8x32xf32>
    %cst_78 = arith.constant 5.000000e-01 : f32
    %210 = vector.broadcast %cst_78 : f32 to vector<8x32xf32>
    %211 = arith.mulf %210, %209 : vector<8x32xf32>
    %212 = math.tanh %192 : vector<8x32xf32>
    %213 = arith.mulf %211, %212 : vector<8x32xf32>
    %214 = vector.extract_strided_slice %178 {offsets = [0, 64], sizes = [8, 32], strides = [1, 1]} : vector<8x128xf32> to vector<8x32xf32>
    %cst_79 = arith.constant 1.000000e+00 : f32
    %215 = vector.broadcast %cst_79 : f32 to vector<8x32xf32>
    %216 = arith.addf %214, %215 : vector<8x32xf32>
    %cst_80 = arith.constant 5.000000e-01 : f32
    %217 = vector.broadcast %cst_80 : f32 to vector<8x32xf32>
    %218 = arith.mulf %217, %216 : vector<8x32xf32>
    %219 = math.tanh %206 : vector<8x32xf32>
    %220 = arith.mulf %218, %219 : vector<8x32xf32>
    %221 = vector.extract_strided_slice %8 {offsets = [32, 0], sizes = [8, 128], strides = [1, 1]} : vector<64x128xf32> to vector<8x128xf32>
    %cst_81 = arith.constant dense<0.000000e+00> : vector<8x128xf32>
    %222 = tpu.matmul %213, %15, %cst_81 {dimension_numbers = #tpu.dot_dimension_numbers<[1], [0], [0], [1], [0, 0, 1, 1], [], []>} : vector<8x32xf32>, vector<32x128xf32>, vector<8x128xf32> -> vector<8x128xf32>
    %223 = arith.addf %221, %222 : vector<8x128xf32>
    %224 = vector.extract_strided_slice %14 {offsets = [24, 0], sizes = [8, 128], strides = [1, 1]} : vector<64x128xf32> to vector<8x128xf32>
    %cst_82 = arith.constant dense<0.000000e+00> : vector<8x128xf32>
    %225 = tpu.matmul %220, %16, %cst_82 {dimension_numbers = #tpu.dot_dimension_numbers<[1], [0], [0], [1], [0, 0, 1, 1], [], []>} : vector<8x32xf32>, vector<32x128xf32>, vector<8x128xf32> -> vector<8x128xf32>
    %226 = arith.addf %224, %225 : vector<8x128xf32>
    %227 = math.tanh %223 : vector<8x128xf32>
    %228 = math.tanh %226 : vector<8x128xf32>
    %229 = vector.extract_strided_slice %227 {offsets = [0, 32], sizes = [8, 32], strides = [1, 1]} : vector<8x128xf32> to vector<8x32xf32>
    %cst_83 = arith.constant 1.000000e+00 : f32
    %230 = vector.broadcast %cst_83 : f32 to vector<8x32xf32>
    %231 = arith.addf %229, %230 : vector<8x32xf32>
    %cst_84 = arith.constant 5.000000e-01 : f32
    %232 = vector.broadcast %cst_84 : f32 to vector<8x32xf32>
    %233 = arith.mulf %232, %231 : vector<8x32xf32>
    %234 = arith.mulf %233, %192 : vector<8x32xf32>
    %235 = vector.extract_strided_slice %227 {offsets = [0, 0], sizes = [8, 32], strides = [1, 1]} : vector<8x128xf32> to vector<8x32xf32>
    %cst_85 = arith.constant 1.000000e+00 : f32
    %236 = vector.broadcast %cst_85 : f32 to vector<8x32xf32>
    %237 = arith.addf %235, %236 : vector<8x32xf32>
    %cst_86 = arith.constant 5.000000e-01 : f32
    %238 = vector.broadcast %cst_86 : f32 to vector<8x32xf32>
    %239 = arith.mulf %238, %237 : vector<8x32xf32>
    %240 = vector.extract_strided_slice %227 {offsets = [0, 96], sizes = [8, 32], strides = [1, 1]} : vector<8x128xf32> to vector<8x32xf32>
    %241 = arith.mulf %239, %240 : vector<8x32xf32>
    %242 = arith.addf %234, %241 : vector<8x32xf32>
    %243 = vector.extract_strided_slice %228 {offsets = [0, 32], sizes = [8, 32], strides = [1, 1]} : vector<8x128xf32> to vector<8x32xf32>
    %cst_87 = arith.constant 1.000000e+00 : f32
    %244 = vector.broadcast %cst_87 : f32 to vector<8x32xf32>
    %245 = arith.addf %243, %244 : vector<8x32xf32>
    %cst_88 = arith.constant 5.000000e-01 : f32
    %246 = vector.broadcast %cst_88 : f32 to vector<8x32xf32>
    %247 = arith.mulf %246, %245 : vector<8x32xf32>
    %248 = arith.mulf %247, %206 : vector<8x32xf32>
    %249 = vector.extract_strided_slice %228 {offsets = [0, 0], sizes = [8, 32], strides = [1, 1]} : vector<8x128xf32> to vector<8x32xf32>
    %cst_89 = arith.constant 1.000000e+00 : f32
    %250 = vector.broadcast %cst_89 : f32 to vector<8x32xf32>
    %251 = arith.addf %249, %250 : vector<8x32xf32>
    %cst_90 = arith.constant 5.000000e-01 : f32
    %252 = vector.broadcast %cst_90 : f32 to vector<8x32xf32>
    %253 = arith.mulf %252, %251 : vector<8x32xf32>
    %254 = vector.extract_strided_slice %228 {offsets = [0, 96], sizes = [8, 32], strides = [1, 1]} : vector<8x128xf32> to vector<8x32xf32>
    %255 = arith.mulf %253, %254 : vector<8x32xf32>
    %256 = arith.addf %248, %255 : vector<8x32xf32>
    %257 = vector.extract_strided_slice %227 {offsets = [0, 64], sizes = [8, 32], strides = [1, 1]} : vector<8x128xf32> to vector<8x32xf32>
    %cst_91 = arith.constant 1.000000e+00 : f32
    %258 = vector.broadcast %cst_91 : f32 to vector<8x32xf32>
    %259 = arith.addf %257, %258 : vector<8x32xf32>
    %cst_92 = arith.constant 5.000000e-01 : f32
    %260 = vector.broadcast %cst_92 : f32 to vector<8x32xf32>
    %261 = arith.mulf %260, %259 : vector<8x32xf32>
    %262 = math.tanh %242 : vector<8x32xf32>
    %263 = arith.mulf %261, %262 : vector<8x32xf32>
    %264 = vector.extract_strided_slice %228 {offsets = [0, 64], sizes = [8, 32], strides = [1, 1]} : vector<8x128xf32> to vector<8x32xf32>
    %cst_93 = arith.constant 1.000000e+00 : f32
    %265 = vector.broadcast %cst_93 : f32 to vector<8x32xf32>
    %266 = arith.addf %264, %265 : vector<8x32xf32>
    %cst_94 = arith.constant 5.000000e-01 : f32
    %267 = vector.broadcast %cst_94 : f32 to vector<8x32xf32>
    %268 = arith.mulf %267, %266 : vector<8x32xf32>
    %269 = math.tanh %256 : vector<8x32xf32>
    %270 = arith.mulf %268, %269 : vector<8x32xf32>
    %271 = vector.extract_strided_slice %8 {offsets = [40, 0], sizes = [8, 128], strides = [1, 1]} : vector<64x128xf32> to vector<8x128xf32>
    %cst_95 = arith.constant dense<0.000000e+00> : vector<8x128xf32>
    %272 = tpu.matmul %263, %15, %cst_95 {dimension_numbers = #tpu.dot_dimension_numbers<[1], [0], [0], [1], [0, 0, 1, 1], [], []>} : vector<8x32xf32>, vector<32x128xf32>, vector<8x128xf32> -> vector<8x128xf32>
    %273 = arith.addf %271, %272 : vector<8x128xf32>
    %274 = vector.extract_strided_slice %14 {offsets = [16, 0], sizes = [8, 128], strides = [1, 1]} : vector<64x128xf32> to vector<8x128xf32>
    %cst_96 = arith.constant dense<0.000000e+00> : vector<8x128xf32>
    %275 = tpu.matmul %270, %16, %cst_96 {dimension_numbers = #tpu.dot_dimension_numbers<[1], [0], [0], [1], [0, 0, 1, 1], [], []>} : vector<8x32xf32>, vector<32x128xf32>, vector<8x128xf32> -> vector<8x128xf32>
    %276 = arith.addf %274, %275 : vector<8x128xf32>
    %277 = math.tanh %273 : vector<8x128xf32>
    %278 = math.tanh %276 : vector<8x128xf32>
    %279 = vector.extract_strided_slice %277 {offsets = [0, 32], sizes = [8, 32], strides = [1, 1]} : vector<8x128xf32> to vector<8x32xf32>
    %cst_97 = arith.constant 1.000000e+00 : f32
    %280 = vector.broadcast %cst_97 : f32 to vector<8x32xf32>
    %281 = arith.addf %279, %280 : vector<8x32xf32>
    %cst_98 = arith.constant 5.000000e-01 : f32
    %282 = vector.broadcast %cst_98 : f32 to vector<8x32xf32>
    %283 = arith.mulf %282, %281 : vector<8x32xf32>
    %284 = arith.mulf %283, %242 : vector<8x32xf32>
    %285 = vector.extract_strided_slice %277 {offsets = [0, 0], sizes = [8, 32], strides = [1, 1]} : vector<8x128xf32> to vector<8x32xf32>
    %cst_99 = arith.constant 1.000000e+00 : f32
    %286 = vector.broadcast %cst_99 : f32 to vector<8x32xf32>
    %287 = arith.addf %285, %286 : vector<8x32xf32>
    %cst_100 = arith.constant 5.000000e-01 : f32
    %288 = vector.broadcast %cst_100 : f32 to vector<8x32xf32>
    %289 = arith.mulf %288, %287 : vector<8x32xf32>
    %290 = vector.extract_strided_slice %277 {offsets = [0, 96], sizes = [8, 32], strides = [1, 1]} : vector<8x128xf32> to vector<8x32xf32>
    %291 = arith.mulf %289, %290 : vector<8x32xf32>
    %292 = arith.addf %284, %291 : vector<8x32xf32>
    %293 = vector.extract_strided_slice %278 {offsets = [0, 32], sizes = [8, 32], strides = [1, 1]} : vector<8x128xf32> to vector<8x32xf32>
    %cst_101 = arith.constant 1.000000e+00 : f32
    %294 = vector.broadcast %cst_101 : f32 to vector<8x32xf32>
    %295 = arith.addf %293, %294 : vector<8x32xf32>
    %cst_102 = arith.constant 5.000000e-01 : f32
    %296 = vector.broadcast %cst_102 : f32 to vector<8x32xf32>
    %297 = arith.mulf %296, %295 : vector<8x32xf32>
    %298 = arith.mulf %297, %256 : vector<8x32xf32>
    %299 = vector.extract_strided_slice %278 {offsets = [0, 0], sizes = [8, 32], strides = [1, 1]} : vector<8x128xf32> to vector<8x32xf32>
    %cst_103 = arith.constant 1.000000e+00 : f32
    %300 = vector.broadcast %cst_103 : f32 to vector<8x32xf32>
    %301 = arith.addf %299, %300 : vector<8x32xf32>
    %cst_104 = arith.constant 5.000000e-01 : f32
    %302 = vector.broadcast %cst_104 : f32 to vector<8x32xf32>
    %303 = arith.mulf %302, %301 : vector<8x32xf32>
    %304 = vector.extract_strided_slice %278 {offsets = [0, 96], sizes = [8, 32], strides = [1, 1]} : vector<8x128xf32> to vector<8x32xf32>
    %305 = arith.mulf %303, %304 : vector<8x32xf32>
    %306 = arith.addf %298, %305 : vector<8x32xf32>
    %307 = vector.extract_strided_slice %277 {offsets = [0, 64], sizes = [8, 32], strides = [1, 1]} : vector<8x128xf32> to vector<8x32xf32>
    %cst_105 = arith.constant 1.000000e+00 : f32
    %308 = vector.broadcast %cst_105 : f32 to vector<8x32xf32>
    %309 = arith.addf %307, %308 : vector<8x32xf32>
    %cst_106 = arith.constant 5.000000e-01 : f32
    %310 = vector.broadcast %cst_106 : f32 to vector<8x32xf32>
    %311 = arith.mulf %310, %309 : vector<8x32xf32>
    %312 = math.tanh %292 : vector<8x32xf32>
    %313 = arith.mulf %311, %312 : vector<8x32xf32>
    %314 = vector.extract_strided_slice %278 {offsets = [0, 64], sizes = [8, 32], strides = [1, 1]} : vector<8x128xf32> to vector<8x32xf32>
    %cst_107 = arith.constant 1.000000e+00 : f32
    %315 = vector.broadcast %cst_107 : f32 to vector<8x32xf32>
    %316 = arith.addf %314, %315 : vector<8x32xf32>
    %cst_108 = arith.constant 5.000000e-01 : f32
    %317 = vector.broadcast %cst_108 : f32 to vector<8x32xf32>
    %318 = arith.mulf %317, %316 : vector<8x32xf32>
    %319 = math.tanh %306 : vector<8x32xf32>
    %320 = arith.mulf %318, %319 : vector<8x32xf32>
    %321 = vector.extract_strided_slice %8 {offsets = [48, 0], sizes = [8, 128], strides = [1, 1]} : vector<64x128xf32> to vector<8x128xf32>
    %cst_109 = arith.constant dense<0.000000e+00> : vector<8x128xf32>
    %322 = tpu.matmul %313, %15, %cst_109 {dimension_numbers = #tpu.dot_dimension_numbers<[1], [0], [0], [1], [0, 0, 1, 1], [], []>} : vector<8x32xf32>, vector<32x128xf32>, vector<8x128xf32> -> vector<8x128xf32>
    %323 = arith.addf %321, %322 : vector<8x128xf32>
    %324 = vector.extract_strided_slice %14 {offsets = [8, 0], sizes = [8, 128], strides = [1, 1]} : vector<64x128xf32> to vector<8x128xf32>
    %cst_110 = arith.constant dense<0.000000e+00> : vector<8x128xf32>
    %325 = tpu.matmul %320, %16, %cst_110 {dimension_numbers = #tpu.dot_dimension_numbers<[1], [0], [0], [1], [0, 0, 1, 1], [], []>} : vector<8x32xf32>, vector<32x128xf32>, vector<8x128xf32> -> vector<8x128xf32>
    %326 = arith.addf %324, %325 : vector<8x128xf32>
    %327 = math.tanh %323 : vector<8x128xf32>
    %328 = math.tanh %326 : vector<8x128xf32>
    %329 = vector.extract_strided_slice %327 {offsets = [0, 32], sizes = [8, 32], strides = [1, 1]} : vector<8x128xf32> to vector<8x32xf32>
    %cst_111 = arith.constant 1.000000e+00 : f32
    %330 = vector.broadcast %cst_111 : f32 to vector<8x32xf32>
    %331 = arith.addf %329, %330 : vector<8x32xf32>
    %cst_112 = arith.constant 5.000000e-01 : f32
    %332 = vector.broadcast %cst_112 : f32 to vector<8x32xf32>
    %333 = arith.mulf %332, %331 : vector<8x32xf32>
    %334 = arith.mulf %333, %292 : vector<8x32xf32>
    %335 = vector.extract_strided_slice %327 {offsets = [0, 0], sizes = [8, 32], strides = [1, 1]} : vector<8x128xf32> to vector<8x32xf32>
    %cst_113 = arith.constant 1.000000e+00 : f32
    %336 = vector.broadcast %cst_113 : f32 to vector<8x32xf32>
    %337 = arith.addf %335, %336 : vector<8x32xf32>
    %cst_114 = arith.constant 5.000000e-01 : f32
    %338 = vector.broadcast %cst_114 : f32 to vector<8x32xf32>
    %339 = arith.mulf %338, %337 : vector<8x32xf32>
    %340 = vector.extract_strided_slice %327 {offsets = [0, 96], sizes = [8, 32], strides = [1, 1]} : vector<8x128xf32> to vector<8x32xf32>
    %341 = arith.mulf %339, %340 : vector<8x32xf32>
    %342 = arith.addf %334, %341 : vector<8x32xf32>
    %343 = vector.extract_strided_slice %328 {offsets = [0, 32], sizes = [8, 32], strides = [1, 1]} : vector<8x128xf32> to vector<8x32xf32>
    %cst_115 = arith.constant 1.000000e+00 : f32
    %344 = vector.broadcast %cst_115 : f32 to vector<8x32xf32>
    %345 = arith.addf %343, %344 : vector<8x32xf32>
    %cst_116 = arith.constant 5.000000e-01 : f32
    %346 = vector.broadcast %cst_116 : f32 to vector<8x32xf32>
    %347 = arith.mulf %346, %345 : vector<8x32xf32>
    %348 = arith.mulf %347, %306 : vector<8x32xf32>
    %349 = vector.extract_strided_slice %328 {offsets = [0, 0], sizes = [8, 32], strides = [1, 1]} : vector<8x128xf32> to vector<8x32xf32>
    %cst_117 = arith.constant 1.000000e+00 : f32
    %350 = vector.broadcast %cst_117 : f32 to vector<8x32xf32>
    %351 = arith.addf %349, %350 : vector<8x32xf32>
    %cst_118 = arith.constant 5.000000e-01 : f32
    %352 = vector.broadcast %cst_118 : f32 to vector<8x32xf32>
    %353 = arith.mulf %352, %351 : vector<8x32xf32>
    %354 = vector.extract_strided_slice %328 {offsets = [0, 96], sizes = [8, 32], strides = [1, 1]} : vector<8x128xf32> to vector<8x32xf32>
    %355 = arith.mulf %353, %354 : vector<8x32xf32>
    %356 = arith.addf %348, %355 : vector<8x32xf32>
    %357 = vector.extract_strided_slice %327 {offsets = [0, 64], sizes = [8, 32], strides = [1, 1]} : vector<8x128xf32> to vector<8x32xf32>
    %cst_119 = arith.constant 1.000000e+00 : f32
    %358 = vector.broadcast %cst_119 : f32 to vector<8x32xf32>
    %359 = arith.addf %357, %358 : vector<8x32xf32>
    %cst_120 = arith.constant 5.000000e-01 : f32
    %360 = vector.broadcast %cst_120 : f32 to vector<8x32xf32>
    %361 = arith.mulf %360, %359 : vector<8x32xf32>
    %362 = math.tanh %342 : vector<8x32xf32>
    %363 = arith.mulf %361, %362 : vector<8x32xf32>
    %364 = vector.extract_strided_slice %328 {offsets = [0, 64], sizes = [8, 32], strides = [1, 1]} : vector<8x128xf32> to vector<8x32xf32>
    %cst_121 = arith.constant 1.000000e+00 : f32
    %365 = vector.broadcast %cst_121 : f32 to vector<8x32xf32>
    %366 = arith.addf %364, %365 : vector<8x32xf32>
    %cst_122 = arith.constant 5.000000e-01 : f32
    %367 = vector.broadcast %cst_122 : f32 to vector<8x32xf32>
    %368 = arith.mulf %367, %366 : vector<8x32xf32>
    %369 = math.tanh %356 : vector<8x32xf32>
    %370 = arith.mulf %368, %369 : vector<8x32xf32>
    %371 = vector.extract_strided_slice %8 {offsets = [56, 0], sizes = [8, 128], strides = [1, 1]} : vector<64x128xf32> to vector<8x128xf32>
    %cst_123 = arith.constant dense<0.000000e+00> : vector<8x128xf32>
    %372 = tpu.matmul %363, %15, %cst_123 {dimension_numbers = #tpu.dot_dimension_numbers<[1], [0], [0], [1], [0, 0, 1, 1], [], []>} : vector<8x32xf32>, vector<32x128xf32>, vector<8x128xf32> -> vector<8x128xf32>
    %373 = arith.addf %371, %372 : vector<8x128xf32>
    %374 = vector.extract_strided_slice %14 {offsets = [0, 0], sizes = [8, 128], strides = [1, 1]} : vector<64x128xf32> to vector<8x128xf32>
    %cst_124 = arith.constant dense<0.000000e+00> : vector<8x128xf32>
    %375 = tpu.matmul %370, %16, %cst_124 {dimension_numbers = #tpu.dot_dimension_numbers<[1], [0], [0], [1], [0, 0, 1, 1], [], []>} : vector<8x32xf32>, vector<32x128xf32>, vector<8x128xf32> -> vector<8x128xf32>
    %376 = arith.addf %374, %375 : vector<8x128xf32>
    %377 = math.tanh %373 : vector<8x128xf32>
    %378 = math.tanh %376 : vector<8x128xf32>
    %379 = vector.extract_strided_slice %377 {offsets = [0, 32], sizes = [8, 32], strides = [1, 1]} : vector<8x128xf32> to vector<8x32xf32>
    %cst_125 = arith.constant 1.000000e+00 : f32
    %380 = vector.broadcast %cst_125 : f32 to vector<8x32xf32>
    %381 = arith.addf %379, %380 : vector<8x32xf32>
    %cst_126 = arith.constant 5.000000e-01 : f32
    %382 = vector.broadcast %cst_126 : f32 to vector<8x32xf32>
    %383 = arith.mulf %382, %381 : vector<8x32xf32>
    %384 = arith.mulf %383, %342 : vector<8x32xf32>
    %385 = vector.extract_strided_slice %377 {offsets = [0, 0], sizes = [8, 32], strides = [1, 1]} : vector<8x128xf32> to vector<8x32xf32>
    %cst_127 = arith.constant 1.000000e+00 : f32
    %386 = vector.broadcast %cst_127 : f32 to vector<8x32xf32>
    %387 = arith.addf %385, %386 : vector<8x32xf32>
    %cst_128 = arith.constant 5.000000e-01 : f32
    %388 = vector.broadcast %cst_128 : f32 to vector<8x32xf32>
    %389 = arith.mulf %388, %387 : vector<8x32xf32>
    %390 = vector.extract_strided_slice %377 {offsets = [0, 96], sizes = [8, 32], strides = [1, 1]} : vector<8x128xf32> to vector<8x32xf32>
    %391 = arith.mulf %389, %390 : vector<8x32xf32>
    %392 = arith.addf %384, %391 : vector<8x32xf32>
    %393 = vector.extract_strided_slice %378 {offsets = [0, 32], sizes = [8, 32], strides = [1, 1]} : vector<8x128xf32> to vector<8x32xf32>
    %cst_129 = arith.constant 1.000000e+00 : f32
    %394 = vector.broadcast %cst_129 : f32 to vector<8x32xf32>
    %395 = arith.addf %393, %394 : vector<8x32xf32>
    %cst_130 = arith.constant 5.000000e-01 : f32
    %396 = vector.broadcast %cst_130 : f32 to vector<8x32xf32>
    %397 = arith.mulf %396, %395 : vector<8x32xf32>
    %398 = arith.mulf %397, %356 : vector<8x32xf32>
    %399 = vector.extract_strided_slice %378 {offsets = [0, 0], sizes = [8, 32], strides = [1, 1]} : vector<8x128xf32> to vector<8x32xf32>
    %cst_131 = arith.constant 1.000000e+00 : f32
    %400 = vector.broadcast %cst_131 : f32 to vector<8x32xf32>
    %401 = arith.addf %399, %400 : vector<8x32xf32>
    %cst_132 = arith.constant 5.000000e-01 : f32
    %402 = vector.broadcast %cst_132 : f32 to vector<8x32xf32>
    %403 = arith.mulf %402, %401 : vector<8x32xf32>
    %404 = vector.extract_strided_slice %378 {offsets = [0, 96], sizes = [8, 32], strides = [1, 1]} : vector<8x128xf32> to vector<8x32xf32>
    %405 = arith.mulf %403, %404 : vector<8x32xf32>
    %406 = arith.addf %398, %405 : vector<8x32xf32>
    %407 = vector.extract_strided_slice %377 {offsets = [0, 64], sizes = [8, 32], strides = [1, 1]} : vector<8x128xf32> to vector<8x32xf32>
    %cst_133 = arith.constant 1.000000e+00 : f32
    %408 = vector.broadcast %cst_133 : f32 to vector<8x32xf32>
    %409 = arith.addf %407, %408 : vector<8x32xf32>
    %cst_134 = arith.constant 5.000000e-01 : f32
    %410 = vector.broadcast %cst_134 : f32 to vector<8x32xf32>
    %411 = arith.mulf %410, %409 : vector<8x32xf32>
    %412 = math.tanh %392 : vector<8x32xf32>
    %413 = arith.mulf %411, %412 : vector<8x32xf32>
    %414 = vector.extract_strided_slice %378 {offsets = [0, 64], sizes = [8, 32], strides = [1, 1]} : vector<8x128xf32> to vector<8x32xf32>
    %cst_135 = arith.constant 1.000000e+00 : f32
    %415 = vector.broadcast %cst_135 : f32 to vector<8x32xf32>
    %416 = arith.addf %414, %415 : vector<8x32xf32>
    %cst_136 = arith.constant 5.000000e-01 : f32
    %417 = vector.broadcast %cst_136 : f32 to vector<8x32xf32>
    %418 = arith.mulf %417, %416 : vector<8x32xf32>
    %419 = math.tanh %406 : vector<8x32xf32>
    %420 = arith.mulf %418, %419 : vector<8x32xf32>
    %c0_137 = arith.constant 0 : index
    %c0_138 = arith.constant 0 : index
    %421 = vector.load %arg12[%c0_137, %c0_138] : memref<8x32xf32, #tpu.memory_space<vmem>>, vector<8x32xf32>
    tpu.vector_store %arg12[%c0_137, %c0_138], %413 {strides = array<i32>} : memref<8x32xf32, #tpu.memory_space<vmem>>, vector<8x32xf32>,
    %c0_139 = arith.constant 0 : index
    %c0_140 = arith.constant 0 : index
    %422 = vector.load %arg13[%c0_139, %c0_140] : memref<8x32xf32, #tpu.memory_space<vmem>>, vector<8x32xf32>
    tpu.vector_store %arg13[%c0_139, %c0_140], %420 {strides = array<i32>} : memref<8x32xf32, #tpu.memory_space<vmem>>, vector<8x32xf32>,
    %c0_141 = arith.constant 0 : index
    %c0_142 = arith.constant 0 : index
    %423 = vector.load %arg14[%c0_141, %c0_142] : memref<8x32xf32, #tpu.memory_space<vmem>>, vector<8x32xf32>
    tpu.vector_store %arg14[%c0_141, %c0_142], %392 {strides = array<i32>} : memref<8x32xf32, #tpu.memory_space<vmem>>, vector<8x32xf32>,
    %c0_143 = arith.constant 0 : index
    %c0_144 = arith.constant 0 : index
    %424 = vector.load %arg15[%c0_143, %c0_144] : memref<8x32xf32, #tpu.memory_space<vmem>>, vector<8x32xf32>
    tpu.vector_store %arg15[%c0_143, %c0_144], %406 {strides = array<i32>} : memref<8x32xf32, #tpu.memory_space<vmem>>, vector<8x32xf32>,
    %c0_i32_145 = arith.constant 0 : i32
    %425 = arith.cmpi eq, %arg0, %c0_i32_145 : i32
    %426 = arith.extui %425 : i1 to i32
    %c0_i32_146 = arith.constant 0 : i32
    %427 = arith.cmpi ne, %426, %c0_i32_146 : i32
    scf.if %427 {
      %c0_147 = arith.constant 0 : index
      %c0_148 = arith.constant 0 : index
      %428 = vector.load %arg9[%c0_147, %c0_148] : memref<1x64xf32, #tpu.memory_space<vmem>>, vector<1x64xf32>
      %429 = vector.extract_strided_slice %428 {offsets = [0, 0], sizes = [1, 32], strides = [1, 1]} : vector<1x64xf32> to vector<1x32xf32>
      %430 = vector.broadcast %429 : vector<1x32xf32> to vector<8x32xf32>
      %431 = arith.mulf %413, %430 : vector<8x32xf32>
      %cst_149 = arith.constant dense<0.000000e+00> : vector<8xf32>
      %432 = vector.multi_reduction <add>, %431, %cst_149 [1] : vector<8x32xf32> to vector<8xf32>
      %433 = vector.shape_cast %432 : vector<8xf32> to vector<8x1xf32>
      %434 = vector.extract_strided_slice %428 {offsets = [0, 32], sizes = [1, 32], strides = [1, 1]} : vector<1x64xf32> to vector<1x32xf32>
      %435 = vector.broadcast %434 : vector<1x32xf32> to vector<8x32xf32>
      %436 = arith.mulf %420, %435 : vector<8x32xf32>
      %cst_150 = arith.constant dense<0.000000e+00> : vector<8xf32>
      %437 = vector.multi_reduction <add>, %436, %cst_150 [1] : vector<8x32xf32> to vector<8xf32>
      %438 = vector.shape_cast %437 : vector<8xf32> to vector<8x1xf32>
      %439 = arith.addf %433, %438 : vector<8x1xf32>
      %c0_151 = arith.constant 0 : index
      %c0_152 = arith.constant 0 : index
      %440 = vector.load %arg10[%c0_151, %c0_152] : memref<1x1xf32, #tpu.memory_space<vmem>>, vector<1x1xf32>
      %441 = vector.broadcast %440 : vector<1x1xf32> to vector<8x1xf32>
      %442 = arith.addf %439, %441 : vector<8x1xf32>
      %443 = arith.negf %442 : vector<8x1xf32>
      %444 = math.exp %443 : vector<8x1xf32>
      %cst_153 = arith.constant 1.000000e+00 : f32
      %445 = vector.broadcast %cst_153 : f32 to vector<8x1xf32>
      %446 = arith.addf %445, %444 : vector<8x1xf32>
      %447 = arith.divf %445, %446 : vector<8x1xf32>
      %c0_154 = arith.constant 0 : index
      %c0_155 = arith.constant 0 : index
      %448 = vector.load %arg11[%c0_154, %c0_155] : memref<8x1xf32, #tpu.memory_space<vmem>>, vector<8x1xf32>
      tpu.vector_store %arg11[%c0_154, %c0_155], %447 {strides = array<i32>} : memref<8x1xf32, #tpu.memory_space<vmem>>, vector<8x1xf32>,
    } else {
    }
    return
  }
  func.func @transform_0(%arg0: i32) -> (i32, i32) {
    %c0_i32 = arith.constant 0 : i32
    %c0_i32_0 = arith.constant 0 : i32
    return %arg0, %c0_i32 : i32, i32
  }
  func.func @transform_1(%arg0: i32) -> (i32, i32) {
    %c0_i32 = arith.constant 0 : i32
    %0 = arith.subi %c0_i32, %arg0 : i32
    %c0_i32_0 = arith.constant 0 : i32
    %c0_i32_1 = arith.constant 0 : i32
    return %0, %c0_i32_0 : i32, i32
  }
  func.func @transform_2(%arg0: i32) -> (i32, i32) {
    %c0_i32 = arith.constant 0 : i32
    %c0_i32_0 = arith.constant 0 : i32
    %c0_i32_1 = arith.constant 0 : i32
    return %c0_i32, %c0_i32_0 : i32, i32
  }
  func.func @transform_3(%arg0: i32) -> (i32, i32) {
    %c0_i32 = arith.constant 0 : i32
    %c0_i32_0 = arith.constant 0 : i32
    %c0_i32_1 = arith.constant 0 : i32
    return %c0_i32, %c0_i32_0 : i32, i32
  }
  func.func @transform_4(%arg0: i32) -> (i32, i32) {
    %c0_i32 = arith.constant 0 : i32
    %c0_i32_0 = arith.constant 0 : i32
    %c0_i32_1 = arith.constant 0 : i32
    return %c0_i32, %c0_i32_0 : i32, i32
  }
  func.func @transform_5(%arg0: i32) -> (i32, i32) {
    %c0_i32 = arith.constant 0 : i32
    %c0_i32_0 = arith.constant 0 : i32
    %c0_i32_1 = arith.constant 0 : i32
    return %c0_i32, %c0_i32_0 : i32, i32
  }
  func.func @transform_6(%arg0: i32) -> (i32, i32) {
    %c0_i32 = arith.constant 0 : i32
    %c0_i32_0 = arith.constant 0 : i32
    %c0_i32_1 = arith.constant 0 : i32
    return %c0_i32, %c0_i32_0 : i32, i32
  }
  func.func @transform_7(%arg0: i32) -> (i32, i32) {
    %c0_i32 = arith.constant 0 : i32
    %c0_i32_0 = arith.constant 0 : i32
    %c0_i32_1 = arith.constant 0 : i32
    return %c0_i32, %c0_i32_0 : i32, i32
  }
  func.func @transform_8(%arg0: i32) -> (i32, i32) {
    %c0_i32 = arith.constant 0 : i32
    %c0_i32_0 = arith.constant 0 : i32
    %c0_i32_1 = arith.constant 0 : i32
    return %c0_i32, %c0_i32_0 : i32, i32
  }
  func.func @transform_9(%arg0: i32) -> (i32, i32) {
    %c0_i32 = arith.constant 0 : i32
    %c0_i32_0 = arith.constant 0 : i32
    %c0_i32_1 = arith.constant 0 : i32
    return %c0_i32, %c0_i32_0 : i32, i32
  }
  func.func @transform_10(%arg0: i32) -> (i32, i32) {
    %c0_i32 = arith.constant 0 : i32
    %c0_i32_0 = arith.constant 0 : i32
    %c0_i32_1 = arith.constant 0 : i32
    return %c0_i32, %c0_i32_0 : i32, i32
  }
}

</mosaic_0001>

<bundles_post_ra>
// kernel: tpu_custom_call.1
= control target key start
LH: loop header
LB: loop body
LE: loop exit
PB: predicated region body
PF: predicated region fallthrough
CT: control target
= control target key end

     0   :  { %s2847_s0 = inlined_call_operand.vmem [shape: bf16[64,16], index: 0, kind: input, shape index: {}]   ;;  %s2848_s1 = inlined_call_operand.vmem [shape: bf16[64,16], index: 1, kind: input, shape index: {}]   ;;  %s2849_s2 = inlined_call_operand.vmem [shape: bf16[16,128], index: 2, kind: input, shape index: {}]   ;;  %s2850_s3 = inlined_call_operand.hbm [shape: bf16[16,128], index: 3, kind: input, shape index: {}]   ;;  %s2851_s4 = inlined_call_operand.vmem [shape: f32[1,128], index: 4, kind: input, shape index: {}]   ;;  %s2852_s5 = inlined_call_operand.vmem [shape: f32[1,128], index: 5, kind: input, shape index: {}]   ;;  %s2853_s6 = inlined_call_operand.vmem [shape: f32[32,128], index: 6, kind: input, shape index: {}]   ;;  %s2854_s7 = inlined_call_operand.vmem [shape: f32[32,128], index: 7, kind: input, shape index: {}]   ;;  %s2855_s8 = inlined_call_operand.vmem [shape: f32[1,64], index: 8, kind: input, shape index: {}]   ;;  %s2856_s9 = inlined_call_operand.<no memory space> [shape: f32[1,1], index: 9, kind: input, shape index: {}]   ;;  %s2857_s10 = inlined_call_operand.vmem [shape: f32[8,1], index: 10, kind: output, shape index: {}]  }
   0x1   :  { %v15_v0 = vstv %s2856_s9 }
   0x2   :  { %16 = vst [vmem:[#allocation6] sm:$0x1] %v15_v0 }
   0x3   :  { %17 = vsyncpa [#allocation8], 0  ;;  %s2388_s15 = smov [#allocation7]  }
   0x4   :  { %s37_s16 = sshll.u32 %s2388_s15, 4  ;;  %s38_s16 = int_to_ptr.vmem [resolvable:$true] %s37_s16 }
   0x5   :  { %s2374_s17 = scalar_lea.vmem %s38_s16, 128  ;;  %p2379_p1 = scmp.lt.s32.totalorder %s38_s16, %s38_s16 }
   0x6   :  { %p2375_p0 = scmp.ne.s32.totalorder %s38_s16, %s2374_s17  ;;  %p2380_p2 = scmp.lt.s32.totalorder %s2374_s17, %s2374_s17 }
   0x8   :  { %p2381_p3 = por %p2380_p2, %p2379_p1 }
   0xa   :  { %p2382_p4 = pnand %p2381_p3, %p2375_p0 }
   0xc   :  { %2385 = shalt.err (!%p2382_p4)
}
   0xd   :  { %s2389_s18 = smov 64   ;;  %s2390_s19 = smov 4  }
   0xe   :  { %43 = dma.hbm_to_vmem [thread:$0]  %s2850_s3, 128, %s38_s16, [#allocation8], %s2389_s18, %s2389_s18, %s2390_s19  }
   0xf   :  { %2386 = dma.done.wait [#allocation8], 128  }
  0x10   :  { %2387 = vsyncadd [#allocation8], 4294967168  ;;  %vm78_vm0 = vcmask 261120   ;;  %v2391_v1 = vmov 0.0   ;;  %v2288_v2 = vld [vmem:[%s2849_s2] sm:$0xff]   ;;  %vm126_vm1 = vcmask 130048  }
  0x11   :  { %79 = vst.msk [vmem:[#allocation2] sm:$0xff] %vm78_vm0, %v2391_v1  ;;  %80 = vst.msk [vmem:[#allocation3] sm:$0xff] %vm78_vm0, %v2391_v1  ;;  %v2289_v3 = vld [vmem:[#allocation7] sm:$0xff]   ;;  %2085 = vmatprep.subr.bf16.mxu0 %v2288_v2  ;;  %v2488_v8 = vld [vmem:[%s2853_s6 + $0x18] sm:$0xff]  ;;  %vm2392_vm2 = vmmov 0   ;;  %vm1943_vm3 = vcmask 7168  }
  0x12   :  { %81 = vst.msk [vmem:[#allocation4] sm:$0xff] %vm78_vm0, %v2391_v1  ;;  %82 = vst.msk [vmem:[#allocation5] sm:$0xff] %vm78_vm0, %v2391_v1  ;;  %v2290_v4 = vld [vmem:[%s2847_s0] sm:$0xff]   ;;  %2095 = vmatprep.subr.bf16.mxu1 %v2289_v3  ;;  %2086 = vmatpush3.bf16.msra.mxu0 %v2288_v2  ;;  %v2292_v6 = vld [vmem:[%s2847_s0 + $0x8] sm:$0xff]  }
  0x13   :  { %v2291_v5 = vld [vmem:[%s2848_s1] sm:$0xff]   ;;  %2096 = vmatpush3.bf16.msra.mxu1 %v2289_v3  ;;  %2087 = vmatprep.mubr.msk.bf16.mxu0 %vm126_vm1, %v2290_v4  ;;  %v2293_v7 = vld [vmem:[%s2848_s1 + $0x8] sm:$0xff]   ;;  %v2494_v9 = vld [vmem:[%s2853_s6 + $0x10] sm:$0xff] }
  0x14   :  { %2097 = vmatprep.mubr.msk.bf16.mxu1 %vm126_vm1, %v2291_v5  ;;  %2105 = vmatprep.subr.mxu0 %v2391_v1  ;;  %v2499_v10 = vld [vmem:[%s2854_s7 + $0x18] sm:$0xff]  ;;  %v2294_v11 = vld [vmem:[%s2847_s0 + $0x10] sm:$0xff]   ;;  %v2525_v15 = vld [vmem:[%s2853_s6 + $0x8] sm:$0xff] }
  0x15   :  { %2088 = vmatmul.mubr.msk.bf16.vlgmr.msra.gmra.mxu0 %vm126_vm1, %v2292_v6  ;;  %2116 = vmatprep.subr.mxu1 %v2391_v1  ;;  %v2295_v12 = vld [vmem:[%s2848_s1 + $0x10] sm:$0xff]   ;;  %v2296_v13 = vld [vmem:[%s2847_s0 + $0x18] sm:$0xff]   ;;  %v2537_v17 = vld [vmem:[%s2853_s6] sm:$0xff]  ;;  %s2393_s6 = smov 32  }
  0x16   :  { %2098 = vmatmul.mubr.msk.bf16.vlgmr.msra.gmra.mxu1 %vm126_vm1, %v2293_v7  ;;  %2106 = vmatpush3.msra.mxu0 %v2488_v8  ;;  %v2297_v14 = vld [vmem:[%s2848_s1 + $0x18] sm:$0xff]   ;;  %v2530_v16 = vld [vmem:[%s2854_s7 + $0x10] sm:$0xff]  ;;  %v2542_v18 = vld [vmem:[%s2854_s7 + $0x8] sm:$0xff] }
  0x17   :  { %2107 = vmatprep.subr.mxu0 %v2391_v1  ;;  %2117 = vmatpush3.msra.mxu1 %v2499_v10  ;;  %v2551_v19 = vld [vmem:[%s2854_s7] sm:$0xff] }
  0x18   :  { %2108 = vmatpush3.msra.mxu0 %v2494_v9  ;;  %2091 = vmatprep.mubr.msk.bf16.mxu0 %vm126_vm1, %v2294_v11  ;;  %v332_v21 = vld [vmem:[#allocation2] sm:$0xff]  ;;  %v333_v23 = vld [vmem:[#allocation3] sm:$0xff] }
  0x19   :  { %2101 = vmatprep.mubr.msk.bf16.mxu1 %vm126_vm1, %v2295_v12  ;;  %2109 = vmatprep.subr.mxu0 %v2391_v1  ;;  %v334_v20 = vld [vmem:[#allocation4] sm:$0xff]  ;;  %v335_v22 = vld [vmem:[#allocation5] sm:$0xff]  ;;  %v1956_v24 = vld [vmem:[%s2851_s4] ss:$0 sm:$0xff] }
  0x1a   :  { %2118 = vmatprep.subr.mxu1 %v2391_v1  ;;  %2110 = vmatpush3.msra.mxu0 %v2525_v15  ;;  %v1966_v25 = vld [vmem:[%s2852_s5] ss:$0 sm:$0xff] }
  0x1b   :  { %2119 = vmatpush3.msra.mxu1 %v2530_v16  ;;  %2111 = vmatprep.subr.mxu0 %v2391_v1 }
  0x1c   :  { %2120 = vmatprep.subr.mxu1 %v2391_v1  ;;  %2112 = vmatpush3.msra.mxu0 %v2537_v17 }
  0x1d   :  { %2092 = vmatmul.mubr.msk.bf16.gmra.mxu0 %vm126_vm1, %v2296_v13  ;;  %2121 = vmatpush3.msra.mxu1 %v2542_v18 }
  0x1e   :  { %2102 = vmatmul.mubr.msk.bf16.gmra.mxu1 %vm126_vm1, %v2297_v14  ;;  %2122 = vmatprep.subr.mxu1 %v2391_v1 }
  0x1f   :  { %2113 = vmatprep.mubr.msk.f32.mxu0 %vm2392_vm2, %v2391_v1  ;;  %2123 = vmatpush3.msra.mxu1 %v2551_v19 }
  0x20   :  { %2124 = vmatprep.mubr.msk.f32.mxu1 %vm2392_vm2, %v2391_v1  ;;  %490 = vrot.lane.b32.xlu1 %v334_v20, %s2393_s6 }
  0x21   :  { %2127 = vmatprep.subr.mxu0 %v2391_v1  ;;  %2138 = vmatprep.subr.mxu1 %v2391_v1 }
  0x24   :  { %507 = vrot.lane.b32.xlu1 %v335_v22, %s2393_s6 }
  0x25   :  { %2114 = vmatmul.mubr.msk.f32.vlgmr.msra.gmra.mxu0 %vm78_vm0, %v332_v21 }
  0x26   :  { %2125 = vmatmul.mubr.msk.f32.vlgmr.msra.gmra.mxu1 %vm78_vm0, %v333_v23  ;;  %2128 = vmatpush3.msra.mxu0 %v2488_v8 }
  0x27   :  { %2129 = vmatprep.subr.mxu0 %v2391_v1  ;;  %2139 = vmatpush3.msra.mxu1 %v2499_v10 }
  0x28   :  { %2130 = vmatpush3.msra.mxu0 %v2494_v9  ;;  %2140 = vmatprep.subr.mxu1 %v2391_v1 }
  0x29   :  { %2131 = vmatprep.subr.mxu0 %v2391_v1  ;;  %2135 = vmatprep.mubr.msk.f32.mxu0 %vm2392_vm2, %v2391_v1 }
  0x2a   :  { %2132 = vmatpush3.msra.mxu0 %v2525_v15  ;;  %2141 = vmatpush3.msra.mxu1 %v2530_v16 }
  0x2b   :  { %2133 = vmatprep.subr.mxu0 %v2391_v1  ;;  %2142 = vmatprep.subr.mxu1 %v2391_v1 }
  0x2c   :  { %2134 = vmatpush3.msra.mxu0 %v2537_v17  ;;  %2143 = vmatpush3.msra.mxu1 %v2542_v18 }
  0x2d   :  { %2144 = vmatprep.subr.mxu1 %v2391_v1  ;;  %2146 = vmatprep.mubr.msk.f32.mxu1 %vm2392_vm2, %v2391_v1 }
  0x2e   :  { %2145 = vmatpush3.msra.mxu1 %v2551_v19  ;;  %2149 = vmatprep.subr.mxu0 %v2391_v1 }
  0x2f   :  { %2160 = vmatprep.subr.mxu1 %v2391_v1 }
  0x92   :  { %v491_v14 = vpop.permute.xlu1 %490 }
  0x96   :  { %v508_v21 = vpop.permute.xlu1 %507 }
  0xd5   :  { %v2089_v26 = vpop.f32.mrf.mxu0 }
  0xd6   :  { %v2593_v27 = vadd.f32 %v2089_v26, %v1956_v24  ;;  %v2099_v28 = vpop.f32.mrf.mxu1 }
  0xd7   :  { %v2595_v29 = vadd.f32 %v2099_v28, %v1966_v25  ;;  %v173_v30 = vpop.f32.mrf.mxu0 }
  0xd8   :  { %v293_v31 = vpop.f32.mrf.mxu1  ;;  %v174_v53 = vadd.f32 %v1956_v24, %v173_v30 }
  0xd9   :  { %v2597_v32 = vadd.f32 %v1966_v25, %v293_v31  ;;  %v2090_v33 = vpop.f32.mrf.mxu0 }
  0xda   :  { %v2599_v34 = vadd.f32 %v2090_v33, %v1956_v24  ;;  %v2100_v35 = vpop.f32.mrf.mxu1 }
  0xdb   :  { %v2601_v36 = vadd.f32 %v2100_v35, %v1966_v25  ;;  %v176_v37 = vpop.f32.mrf.mxu0 }
  0xdc   :  { %v2603_v38 = vadd.f32 %v1956_v24, %v176_v37  ;;  %v296_v39 = vpop.f32.mrf.mxu1 }
  0xdd   :  { %v2605_v40 = vadd.f32 %v1966_v25, %v296_v39  ;;  %v2093_v41 = vpop.f32.mrf.mxu0 }
  0xde   :  { %v2607_v42 = vadd.f32 %v2093_v41, %v1956_v24  ;;  %v2103_v43 = vpop.f32.mrf.mxu1 }
  0xdf   :  { %v2609_v44 = vadd.f32 %v2103_v43, %v1966_v25  ;;  %v189_v45 = vpop.f32.mrf.mxu0 }
  0xe0   :  { %v2611_v46 = vadd.f32 %v1956_v24, %v189_v45  ;;  %v309_v47 = vpop.f32.mrf.mxu1 }
  0xe1   :  { %v2613_v48 = vadd.f32 %v1966_v25, %v309_v47  ;;  %v2094_v49 = vpop.f32.mrf.mxu0 }
  0xe2   :  { %v2615_v50 = vadd.f32 %v2094_v49, %v1956_v24  ;;  %v2104_v51 = vpop.f32.mrf.mxu1 }
  0xe3   :  { %v192_v52 = vpop.f32.mrf.mxu0  ;;  %v321_v58 = vadd.f32 %v2104_v51, %v1966_v25 }
  0xe4   :  { %v2617_v54 = vadd.f32 %v1956_v24, %v192_v52  ;;  %v312_v55 = vpop.f32.mrf.mxu1 }
  0xe5   :  { %v2619_v56 = vadd.f32 %v1966_v25, %v312_v55  ;;  %v406_v57 = vpop.f32.mrf.mxu0 }
  0xe6   :  { %v410_v59 = vadd.f32 %v406_v57, %v174_v53  ;;  %v480_v60 = vpop.f32.mrf.mxu1 }
  0xe7   :  { %v2115_v61 = vpop.f32.mrf.mxu0  ;;  %v484_v62 = vadd.f32 %v480_v60, %v321_v58 }
  0xe8   :  { %2298 = vtanh.f32 %v410_v59  ;;  %v2126_v63 = vpop.f32.mrf.mxu1 }
  0xe9   :  { %2300 = vtanh.f32 %v484_v62 }
  0xf5   :  { %v2299_v0 = vpop.eup %2298 }
  0xf6   :  { %495 = vrot.lane.b32.xlu0 %v2299_v0, %s2393_s6  ;;  %v2301_v2 = vpop.eup %2300  ;;  %v487_v3 = vadd.f32 1.0, %v2299_v0 }
  0xf7   :  { %v504_v5 = vadd.f32 1.0, %v2301_v2 }
  0xf8   :  { %v488_v4 = vmul.f32 0.5, %v487_v3 }
  0xf9   :  { %v505_v11 = vmul.f32 0.5, %v504_v5 }
  0xfa   :  { %512 = vrot.lane.b32.xlu0 %v2301_v2, %s2393_s6  ;;  %v493_v20 = vmul.f32 %v491_v14, %v488_v4 }
  0xfb   :  { %v510_v24 = vmul.f32 %v508_v21, %v505_v11 }
 0x168   :  { %v496_v6 = vpop.permute.xlu0 %495 }
 0x169   :  { %v498_v7 = vmul.f32 %v496_v6, %v488_v4 }
 0x16b   :  { %500 = vrot.lane.b32.xlu0 %v498_v7, %s2393_s6 }
 0x16c   :  { %v513_v12 = vpop.permute.xlu0 %512 }
 0x16d   :  { %v515_v13 = vmul.f32 %v513_v12, %v505_v11 }
 0x16f   :  { %517 = vrot.lane.b32.xlu1 %v515_v13, %s2393_s6 }
 0x1dd   :  { %v501_v22 = vpop.permute.xlu0 %500 }
 0x1de   :  { %v503_v23 = vadd.f32 %v501_v22, %v493_v20 }
 0x1e0   :  { %2302 = vtanh.f32 %v503_v23 }
 0x1e1   :  { %v518_v25 = vpop.permute.xlu1 %517 }
 0x1e2   :  { %v520_v26 = vadd.f32 %v518_v25, %v510_v24 }
 0x1e4   :  { %2304 = vtanh.f32 %v520_v26 }
 0x1ed   :  { %v2303_v28 = vpop.eup %2302 }
 0x1ee   :  { %523 = vrot.lane.b32.xlu0 %v2303_v28, %s2393_s6 }
 0x1f1   :  { %v2305_v30 = vpop.eup %2304 }
 0x1f2   :  { %529 = vrot.lane.b32.xlu1 %v2305_v30, %s2393_s6 }
 0x260   :  { %v524_v31 = vpop.permute.xlu0 %523 }
 0x261   :  { %v526_v33 = vmul.f32 %v524_v31, %v488_v4 }
 0x263   :  { %534 = vrot.lane.b32.xlu0 %v526_v33, %s2389_s18 }
 0x264   :  { %v530_v35 = vpop.permute.xlu1 %529 }
 0x265   :  { %v532_v37 = vmul.f32 %v530_v35, %v505_v11 }
 0x267   :  { %610 = vrot.lane.b32.xlu1 %v532_v37, %s2389_s18 }
 0x2d5   :  { %v535_v39 = vpop.permute.xlu0 %534 }
 0x2d6   :  { %2136 = vmatmul.mubr.msk.f32.vlgmr.msra.gmra.mxu0 %vm78_vm0, %v535_v39 }
 0x2d7   :  { %2150 = vmatpush3.msra.mxu0 %v2488_v8  ;;  %2157 = vmatprep.mubr.msk.f32.mxu0 %vm2392_vm2, %v2391_v1 }
 0x2d8   :  { %2151 = vmatprep.subr.mxu0 %v2391_v1 }
 0x2d9   :  { %v611_v41 = vpop.permute.xlu1 %610  ;;  %2152 = vmatpush3.msra.mxu0 %v2494_v9 }
 0x2da   :  { %2147 = vmatmul.mubr.msk.f32.vlgmr.msra.gmra.mxu1 %vm78_vm0, %v611_v41  ;;  %2153 = vmatprep.subr.mxu0 %v2391_v1 }
 0x2db   :  { %2154 = vmatpush3.msra.mxu0 %v2525_v15  ;;  %2161 = vmatpush3.msra.mxu1 %v2499_v10 }
 0x2dc   :  { %2155 = vmatprep.subr.mxu0 %v2391_v1  ;;  %2162 = vmatprep.subr.mxu1 %v2391_v1 }
 0x2dd   :  { %2156 = vmatpush3.msra.mxu0 %v2537_v17  ;;  %2163 = vmatpush3.msra.mxu1 %v2530_v16 }
 0x2de   :  { %2164 = vmatprep.subr.mxu1 %v2391_v1  ;;  %2168 = vmatprep.mubr.msk.f32.mxu1 %vm2392_vm2, %v2391_v1 }
 0x2df   :  { %2165 = vmatpush3.msra.mxu1 %v2542_v18  ;;  %2171 = vmatprep.subr.mxu0 %v2391_v1 }
 0x2e0   :  { %2166 = vmatprep.subr.mxu1 %v2391_v1 }
 0x2e1   :  { %2167 = vmatpush3.msra.mxu1 %v2551_v19 }
 0x2e2   :  { %2182 = vmatprep.subr.mxu1 %v2391_v1 }
 0x396   :  { %v604_v43 = vpop.f32.mrf.mxu0 }
 0x397   :  { %v608_v45 = vadd.f32 %v604_v43, %v2603_v38 }
 0x398   :  { %v2137_v47 = vpop.f32.mrf.mxu0 }
 0x399   :  { %2306 = vtanh.f32 %v608_v45 }
 0x39a   :  { %v680_v49 = vpop.f32.mrf.mxu1 }
 0x39b   :  { %v684_v51 = vadd.f32 %v680_v49, %v2609_v44 }
 0x39c   :  { %v2148_v52 = vpop.f32.mrf.mxu1 }
 0x39d   :  { %2308 = vtanh.f32 %v684_v51 }
 0x3a6   :  { %v2307_v53 = vpop.eup %2306 }
 0x3a7   :  { %691 = vrot.lane.b32.xlu0 %v2307_v53, %s2393_s6  ;;  %v687_v57 = vadd.f32 1.0, %v2307_v53 }
 0x3a9   :  { %v688_v58 = vmul.f32 0.5, %v687_v57 }
 0x3aa   :  { %v2309_v55 = vpop.eup %2308 }
 0x3ab   :  { %704 = vrot.lane.b32.xlu1 %v2309_v55, %s2393_s6  ;;  %v700_v59 = vadd.f32 1.0, %v2309_v55  ;;  %v689_v44 = vmul.f32 %v688_v58, %v503_v23 }
 0x3ad   :  { %v701_v38 = vmul.f32 0.5, %v700_v59 }
 0x3af   :  { %v702_v3 = vmul.f32 %v701_v38, %v520_v26 }
 0x419   :  { %v692_v60 = vpop.permute.xlu0 %691 }
 0x41a   :  { %v694_v61 = vmul.f32 %v692_v60, %v688_v58 }
 0x41c   :  { %696 = vrot.lane.b32.xlu0 %v694_v61, %s2393_s6 }
 0x41d   :  { %v705_v62 = vpop.permute.xlu1 %704 }
 0x41e   :  { %v707_v63 = vmul.f32 %v705_v62, %v701_v38 }
 0x420   :  { %709 = vrot.lane.b32.xlu1 %v707_v63, %s2393_s6 }
 0x48e   :  { %v697_v0 = vpop.permute.xlu0 %696 }
 0x48f   :  { %v699_v2 = vadd.f32 %v697_v0, %v689_v44 }
 0x491   :  { %2310 = vtanh.f32 %v699_v2 }
 0x492   :  { %v710_v4 = vpop.permute.xlu1 %709 }
 0x493   :  { %v712_v5 = vadd.f32 %v710_v4, %v702_v3 }
 0x495   :  { %2312 = vtanh.f32 %v712_v5 }
 0x49e   :  { %v2311_v6 = vpop.eup %2310 }
 0x49f   :  { %715 = vrot.lane.b32.xlu0 %v2311_v6, %s2393_s6 }
 0x4a2   :  { %v2313_v7 = vpop.eup %2312 }
 0x4a3   :  { %721 = vrot.lane.b32.xlu1 %v2313_v7, %s2393_s6 }
 0x511   :  { %v716_v11 = vpop.permute.xlu0 %715 }
 0x512   :  { %v718_v12 = vmul.f32 %v716_v11, %v688_v58 }
 0x514   :  { %726 = vrot.lane.b32.xlu0 %v718_v12, %s2389_s18 }
 0x515   :  { %v722_v13 = vpop.permute.xlu1 %721 }
 0x516   :  { %v724_v14 = vmul.f32 %v722_v13, %v701_v38 }
 0x518   :  { %802 = vrot.lane.b32.xlu1 %v724_v14, %s2389_s18 }
 0x586   :  { %v727_v20 = vpop.permute.xlu0 %726 }
 0x587   :  { %2158 = vmatmul.mubr.msk.f32.vlgmr.msra.gmra.mxu0 %vm78_vm0, %v727_v20 }
 0x588   :  { %2172 = vmatpush3.msra.mxu0 %v2488_v8  ;;  %2179 = vmatprep.mubr.msk.f32.mxu0 %vm2392_vm2, %v2391_v1 }
 0x589   :  { %2173 = vmatprep.subr.mxu0 %v2391_v1 }
 0x58a   :  { %v803_v21 = vpop.permute.xlu1 %802  ;;  %2174 = vmatpush3.msra.mxu0 %v2494_v9 }
 0x58b   :  { %2169 = vmatmul.mubr.msk.f32.vlgmr.msra.gmra.mxu1 %vm78_vm0, %v803_v21  ;;  %2175 = vmatprep.subr.mxu0 %v2391_v1 }
 0x58c   :  { %2176 = vmatpush3.msra.mxu0 %v2525_v15  ;;  %2183 = vmatpush3.msra.mxu1 %v2499_v10 }
 0x58d   :  { %2177 = vmatprep.subr.mxu0 %v2391_v1  ;;  %2184 = vmatprep.subr.mxu1 %v2391_v1 }
 0x58e   :  { %2178 = vmatpush3.msra.mxu0 %v2537_v17  ;;  %2185 = vmatpush3.msra.mxu1 %v2530_v16 }
 0x58f   :  { %2186 = vmatprep.subr.mxu1 %v2391_v1  ;;  %2190 = vmatprep.mubr.msk.f32.mxu1 %vm2392_vm2, %v2391_v1 }
 0x590   :  { %2187 = vmatpush3.msra.mxu1 %v2542_v18  ;;  %2193 = vmatprep.subr.mxu0 %v2391_v1 }
 0x591   :  { %2188 = vmatprep.subr.mxu1 %v2391_v1 }
 0x592   :  { %2189 = vmatpush3.msra.mxu1 %v2551_v19 }
 0x593   :  { %2204 = vmatprep.subr.mxu1 %v2391_v1 }
 0x647   :  { %v796_v22 = vpop.f32.mrf.mxu0 }
 0x648   :  { %v800_v23 = vadd.f32 %v796_v22, %v2593_v27 }
 0x649   :  { %v2159_v24 = vpop.f32.mrf.mxu0 }
 0x64a   :  { %2314 = vtanh.f32 %v800_v23 }
 0x64b   :  { %v872_v25 = vpop.f32.mrf.mxu1 }
 0x64c   :  { %v876_v26 = vadd.f32 %v872_v25, %v2619_v56 }
 0x64d   :  { %v2170_v28 = vpop.f32.mrf.mxu1 }
 0x64e   :  { %2316 = vtanh.f32 %v876_v26 }
 0x657   :  { %v2315_v30 = vpop.eup %2314 }
 0x658   :  { %883 = vrot.lane.b32.xlu0 %v2315_v30, %s2393_s6  ;;  %v879_v33 = vadd.f32 1.0, %v2315_v30 }
 0x65a   :  { %v880_v35 = vmul.f32 0.5, %v879_v33 }
 0x65b   :  { %v2317_v31 = vpop.eup %2316 }
 0x65c   :  { %896 = vrot.lane.b32.xlu1 %v2317_v31, %s2393_s6  ;;  %v892_v37 = vadd.f32 1.0, %v2317_v31  ;;  %v881_v56 = vmul.f32 %v880_v35, %v699_v2 }
 0x65e   :  { %v893_v27 = vmul.f32 0.5, %v892_v37 }
 0x660   :  { %v894_v51 = vmul.f32 %v893_v27, %v712_v5 }
 0x6ca   :  { %v884_v39 = vpop.permute.xlu0 %883 }
 0x6cb   :  { %v886_v41 = vmul.f32 %v884_v39, %v880_v35 }
 0x6cd   :  { %888 = vrot.lane.b32.xlu0 %v886_v41, %s2393_s6 }
 0x6ce   :  { %v897_v43 = vpop.permute.xlu1 %896 }
 0x6cf   :  { %v899_v45 = vmul.f32 %v897_v43, %v893_v27 }
 0x6d1   :  { %901 = vrot.lane.b32.xlu1 %v899_v45, %s2393_s6 }
 0x73f   :  { %v889_v47 = vpop.permute.xlu0 %888 }
 0x740   :  { %v891_v49 = vadd.f32 %v889_v47, %v881_v56 }
 0x742   :  { %2318 = vtanh.f32 %v891_v49 }
 0x743   :  { %v902_v52 = vpop.permute.xlu1 %901 }
 0x744   :  { %v904_v53 = vadd.f32 %v902_v52, %v894_v51 }
 0x746   :  { %2320 = vtanh.f32 %v904_v53 }
 0x74f   :  { %v2319_v55 = vpop.eup %2318 }
 0x750   :  { %907 = vrot.lane.b32.xlu0 %v2319_v55, %s2393_s6 }
 0x753   :  { %v2321_v57 = vpop.eup %2320 }
 0x754   :  { %913 = vrot.lane.b32.xlu1 %v2321_v57, %s2393_s6 }
 0x7c2   :  { %v908_v58 = vpop.permute.xlu0 %907 }
 0x7c3   :  { %v910_v59 = vmul.f32 %v908_v58, %v880_v35 }
 0x7c5   :  { %918 = vrot.lane.b32.xlu0 %v910_v59, %s2389_s18 }
 0x7c6   :  { %v914_v60 = vpop.permute.xlu1 %913 }
 0x7c7   :  { %v916_v61 = vmul.f32 %v914_v60, %v893_v27 }
 0x7c9   :  { %994 = vrot.lane.b32.xlu1 %v916_v61, %s2389_s18 }
 0x837   :  { %v919_v38 = vpop.permute.xlu0 %918 }
 0x838   :  { %2180 = vmatmul.mubr.msk.f32.vlgmr.msra.gmra.mxu0 %vm78_vm0, %v919_v38 }
 0x839   :  { %2194 = vmatpush3.msra.mxu0 %v2488_v8  ;;  %2201 = vmatprep.mubr.msk.f32.mxu0 %vm2392_vm2, %v2391_v1 }
 0x83a   :  { %2195 = vmatprep.subr.mxu0 %v2391_v1 }
 0x83b   :  { %v995_v62 = vpop.permute.xlu1 %994  ;;  %2196 = vmatpush3.msra.mxu0 %v2494_v9 }
 0x83c   :  { %2191 = vmatmul.mubr.msk.f32.vlgmr.msra.gmra.mxu1 %vm78_vm0, %v995_v62  ;;  %2197 = vmatprep.subr.mxu0 %v2391_v1 }
 0x83d   :  { %2198 = vmatpush3.msra.mxu0 %v2525_v15  ;;  %2205 = vmatpush3.msra.mxu1 %v2499_v10 }
 0x83e   :  { %2199 = vmatprep.subr.mxu0 %v2391_v1  ;;  %2206 = vmatprep.subr.mxu1 %v2391_v1 }
 0x83f   :  { %2200 = vmatpush3.msra.mxu0 %v2537_v17  ;;  %2207 = vmatpush3.msra.mxu1 %v2530_v16 }
 0x840   :  { %2208 = vmatprep.subr.mxu1 %v2391_v1  ;;  %2212 = vmatprep.mubr.msk.f32.mxu1 %vm2392_vm2, %v2391_v1 }
 0x841   :  { %2209 = vmatpush3.msra.mxu1 %v2542_v18  ;;  %2215 = vmatprep.subr.mxu0 %v2391_v1 }
 0x842   :  { %2210 = vmatprep.subr.mxu1 %v2391_v1 }
 0x843   :  { %2211 = vmatpush3.msra.mxu1 %v2551_v19 }
 0x844   :  { %2226 = vmatprep.subr.mxu1 %v2391_v1 }
 0x8f8   :  { %v988_v63 = vpop.f32.mrf.mxu0 }
 0x8f9   :  { %v992_v44 = vadd.f32 %v988_v63, %v2599_v34 }
 0x8fa   :  { %v2181_v0 = vpop.f32.mrf.mxu0 }
 0x8fb   :  { %2322 = vtanh.f32 %v992_v44 }
 0x8fc   :  { %v1064_v2 = vpop.f32.mrf.mxu1 }
 0x8fd   :  { %v1068_v3 = vadd.f32 %v1064_v2, %v2613_v48 }
 0x8fe   :  { %v2192_v4 = vpop.f32.mrf.mxu1 }
 0x8ff   :  { %2324 = vtanh.f32 %v1068_v3 }
 0x908   :  { %v2323_v5 = vpop.eup %2322 }
 0x909   :  { %1075 = vrot.lane.b32.xlu0 %v2323_v5, %s2393_s6  ;;  %v1071_v7 = vadd.f32 1.0, %v2323_v5 }
 0x90b   :  { %v1072_v11 = vmul.f32 0.5, %v1071_v7 }
 0x90c   :  { %v2325_v6 = vpop.eup %2324 }
 0x90d   :  { %1088 = vrot.lane.b32.xlu1 %v2325_v6, %s2393_s6  ;;  %v1084_v12 = vadd.f32 1.0, %v2325_v6  ;;  %v1073_v48 = vmul.f32 %v1072_v11, %v891_v49 }
 0x90f   :  { %v1085_v34 = vmul.f32 0.5, %v1084_v12 }
 0x911   :  { %v1086_v24 = vmul.f32 %v1085_v34, %v904_v53 }
 0x97b   :  { %v1076_v13 = vpop.permute.xlu0 %1075 }
 0x97c   :  { %v1078_v14 = vmul.f32 %v1076_v13, %v1072_v11 }
 0x97e   :  { %1080 = vrot.lane.b32.xlu0 %v1078_v14, %s2393_s6 }
 0x97f   :  { %v1089_v20 = vpop.permute.xlu1 %1088 }
 0x980   :  { %v1091_v21 = vmul.f32 %v1089_v20, %v1085_v34 }
 0x982   :  { %1093 = vrot.lane.b32.xlu1 %v1091_v21, %s2393_s6 }
 0x9f0   :  { %v1081_v22 = vpop.permute.xlu0 %1080 }
 0x9f1   :  { %v1083_v23 = vadd.f32 %v1081_v22, %v1073_v48 }
 0x9f3   :  { %2326 = vtanh.f32 %v1083_v23 }
 0x9f4   :  { %v1094_v25 = vpop.permute.xlu1 %1093 }
 0x9f5   :  { %v1096_v26 = vadd.f32 %v1094_v25, %v1086_v24 }
 0x9f7   :  { %2328 = vtanh.f32 %v1096_v26 }
 0xa00   :  { %v2327_v28 = vpop.eup %2326 }
 0xa01   :  { %1099 = vrot.lane.b32.xlu0 %v2327_v28, %s2393_s6 }
 0xa04   :  { %v2329_v30 = vpop.eup %2328 }
 0xa05   :  { %1105 = vrot.lane.b32.xlu1 %v2329_v30, %s2393_s6 }
 0xa73   :  { %v1100_v31 = vpop.permute.xlu0 %1099 }
 0xa74   :  { %v1102_v33 = vmul.f32 %v1100_v31, %v1072_v11 }
 0xa76   :  { %1110 = vrot.lane.b32.xlu0 %v1102_v33, %s2389_s18 }
 0xa77   :  { %v1106_v35 = vpop.permute.xlu1 %1105 }
 0xa78   :  { %v1108_v37 = vmul.f32 %v1106_v35, %v1085_v34 }
 0xa7a   :  { %1186 = vrot.lane.b32.xlu1 %v1108_v37, %s2389_s18 }
 0xae8   :  { %v1111_v39 = vpop.permute.xlu0 %1110 }
 0xae9   :  { %2202 = vmatmul.mubr.msk.f32.vlgmr.msra.gmra.mxu0 %vm78_vm0, %v1111_v39 }
 0xaea   :  { %2216 = vmatpush3.msra.mxu0 %v2488_v8  ;;  %2223 = vmatprep.mubr.msk.f32.mxu0 %vm2392_vm2, %v2391_v1 }
 0xaeb   :  { %2217 = vmatprep.subr.mxu0 %v2391_v1 }
 0xaec   :  { %v1187_v41 = vpop.permute.xlu1 %1186  ;;  %2218 = vmatpush3.msra.mxu0 %v2494_v9 }
 0xaed   :  { %2213 = vmatmul.mubr.msk.f32.vlgmr.msra.gmra.mxu1 %vm78_vm0, %v1187_v41  ;;  %2219 = vmatprep.subr.mxu0 %v2391_v1 }
 0xaee   :  { %2220 = vmatpush3.msra.mxu0 %v2525_v15  ;;  %2227 = vmatpush3.msra.mxu1 %v2499_v10 }
 0xaef   :  { %2221 = vmatprep.subr.mxu0 %v2391_v1  ;;  %2228 = vmatprep.subr.mxu1 %v2391_v1 }
 0xaf0   :  { %2222 = vmatpush3.msra.mxu0 %v2537_v17  ;;  %2229 = vmatpush3.msra.mxu1 %v2530_v16 }
 0xaf1   :  { %2230 = vmatprep.subr.mxu1 %v2391_v1  ;;  %2234 = vmatprep.mubr.msk.f32.mxu1 %vm2392_vm2, %v2391_v1 }
 0xaf2   :  { %2231 = vmatpush3.msra.mxu1 %v2542_v18  ;;  %2237 = vmatprep.subr.mxu0 %v2391_v1 }
 0xaf3   :  { %2232 = vmatprep.subr.mxu1 %v2391_v1 }
 0xaf4   :  { %2233 = vmatpush3.msra.mxu1 %v2551_v19 }
 0xaf5   :  { %2248 = vmatprep.subr.mxu1 %v2391_v1 }
 0xba9   :  { %v1180_v27 = vpop.f32.mrf.mxu0 }
 0xbaa   :  { %v1184_v43 = vadd.f32 %v1180_v27, %v2611_v46 }
 0xbab   :  { %v2203_v45 = vpop.f32.mrf.mxu0 }
 0xbac   :  { %2330 = vtanh.f32 %v1184_v43 }
 0xbad   :  { %v1256_v56 = vpop.f32.mrf.mxu1 }
 0xbae   :  { %v1260_v47 = vadd.f32 %v1256_v56, %v2601_v36 }
 0xbaf   :  { %v2214_v49 = vpop.f32.mrf.mxu1 }
 0xbb0   :  { %2332 = vtanh.f32 %v1260_v47 }
 0xbb9   :  { %v2331_v51 = vpop.eup %2330 }
 0xbba   :  { %1267 = vrot.lane.b32.xlu0 %v2331_v51, %s2393_s6  ;;  %v1263_v53 = vadd.f32 1.0, %v2331_v51 }
 0xbbc   :  { %v1264_v55 = vmul.f32 0.5, %v1263_v53 }
 0xbbd   :  { %v2333_v52 = vpop.eup %2332 }
 0xbbe   :  { %1280 = vrot.lane.b32.xlu1 %v2333_v52, %s2393_s6  ;;  %v1276_v57 = vadd.f32 1.0, %v2333_v52  ;;  %v1265_v36 = vmul.f32 %v1264_v55, %v1083_v23 }
 0xbc0   :  { %v1277_v46 = vmul.f32 0.5, %v1276_v57 }
 0xbc2   :  { %v1278_v63 = vmul.f32 %v1277_v46, %v1096_v26 }
 0xc2c   :  { %v1268_v58 = vpop.permute.xlu0 %1267 }
 0xc2d   :  { %v1270_v59 = vmul.f32 %v1268_v58, %v1264_v55 }
 0xc2f   :  { %1272 = vrot.lane.b32.xlu0 %v1270_v59, %s2393_s6 }
 0xc30   :  { %v1281_v60 = vpop.permute.xlu1 %1280 }
 0xc31   :  { %v1283_v61 = vmul.f32 %v1281_v60, %v1277_v46 }
 0xc33   :  { %1285 = vrot.lane.b32.xlu1 %v1283_v61, %s2393_s6 }
 0xca1   :  { %v1273_v38 = vpop.permute.xlu0 %1272 }
 0xca2   :  { %v1275_v62 = vadd.f32 %v1273_v38, %v1265_v36 }
 0xca4   :  { %2334 = vtanh.f32 %v1275_v62 }
 0xca5   :  { %v1286_v44 = vpop.permute.xlu1 %1285 }
 0xca6   :  { %v1288_v0 = vadd.f32 %v1286_v44, %v1278_v63 }
 0xca8   :  { %2336 = vtanh.f32 %v1288_v0 }
 0xcb1   :  { %v2335_v2 = vpop.eup %2334 }
 0xcb2   :  { %1291 = vrot.lane.b32.xlu0 %v2335_v2, %s2393_s6 }
 0xcb5   :  { %v2337_v3 = vpop.eup %2336 }
 0xcb6   :  { %1297 = vrot.lane.b32.xlu1 %v2337_v3, %s2393_s6 }
 0xd24   :  { %v1292_v4 = vpop.permute.xlu0 %1291 }
 0xd25   :  { %v1294_v5 = vmul.f32 %v1292_v4, %v1264_v55 }
 0xd27   :  { %1302 = vrot.lane.b32.xlu0 %v1294_v5, %s2389_s18 }
 0xd28   :  { %v1298_v6 = vpop.permute.xlu1 %1297 }
 0xd29   :  { %v1300_v7 = vmul.f32 %v1298_v6, %v1277_v46 }
 0xd2b   :  { %1378 = vrot.lane.b32.xlu1 %v1300_v7, %s2389_s18 }
 0xd99   :  { %v1303_v11 = vpop.permute.xlu0 %1302 }
 0xd9a   :  { %2224 = vmatmul.mubr.msk.f32.vlgmr.msra.gmra.mxu0 %vm78_vm0, %v1303_v11 }
 0xd9b   :  { %2238 = vmatpush3.msra.mxu0 %v2488_v8  ;;  %2245 = vmatprep.mubr.msk.f32.mxu0 %vm2392_vm2, %v2391_v1 }
 0xd9c   :  { %2239 = vmatprep.subr.mxu0 %v2391_v1 }
 0xd9d   :  { %v1379_v12 = vpop.permute.xlu1 %1378  ;;  %2240 = vmatpush3.msra.mxu0 %v2494_v9 }
 0xd9e   :  { %2235 = vmatmul.mubr.msk.f32.vlgmr.msra.gmra.mxu1 %vm78_vm0, %v1379_v12  ;;  %2241 = vmatprep.subr.mxu0 %v2391_v1 }
 0xd9f   :  { %2242 = vmatpush3.msra.mxu0 %v2525_v15  ;;  %2249 = vmatpush3.msra.mxu1 %v2499_v10 }
 0xda0   :  { %2243 = vmatprep.subr.mxu0 %v2391_v1  ;;  %2250 = vmatprep.subr.mxu1 %v2391_v1 }
 0xda1   :  { %2244 = vmatpush3.msra.mxu0 %v2537_v17  ;;  %2251 = vmatpush3.msra.mxu1 %v2530_v16 }
 0xda2   :  { %2252 = vmatprep.subr.mxu1 %v2391_v1  ;;  %2256 = vmatprep.mubr.msk.f32.mxu1 %vm2392_vm2, %v2391_v1 }
 0xda3   :  { %2253 = vmatpush3.msra.mxu1 %v2542_v18  ;;  %2259 = vmatprep.subr.mxu0 %v2391_v1 }
 0xda4   :  { %2254 = vmatprep.subr.mxu1 %v2391_v1 }
 0xda5   :  { %2255 = vmatpush3.msra.mxu1 %v2551_v19 }
 0xda6   :  { %2270 = vmatprep.subr.mxu1 %v2391_v1 }
 0xe5a   :  { %v1372_v13 = vpop.f32.mrf.mxu0 }
 0xe5b   :  { %v1376_v14 = vadd.f32 %v1372_v13, %v2617_v54 }
 0xe5c   :  { %v2225_v34 = vpop.f32.mrf.mxu0 }
 0xe5d   :  { %2338 = vtanh.f32 %v1376_v14 }
 0xe5e   :  { %v1448_v20 = vpop.f32.mrf.mxu1 }
 0xe5f   :  { %v1452_v21 = vadd.f32 %v1448_v20, %v2595_v29 }
 0xe60   :  { %v2236_v48 = vpop.f32.mrf.mxu1 }
 0xe61   :  { %2340 = vtanh.f32 %v1452_v21 }
 0xe6a   :  { %v2339_v22 = vpop.eup %2338 }
 0xe6b   :  { %1459 = vrot.lane.b32.xlu0 %v2339_v22, %s2393_s6  ;;  %v1455_v24 = vadd.f32 1.0, %v2339_v22 }
 0xe6d   :  { %v1456_v25 = vmul.f32 0.5, %v1455_v24 }
 0xe6e   :  { %v2341_v23 = vpop.eup %2340 }
 0xe6f   :  { %1472 = vrot.lane.b32.xlu1 %v2341_v23, %s2393_s6  ;;  %v1468_v26 = vadd.f32 1.0, %v2341_v23  ;;  %v1457_v29 = vmul.f32 %v1456_v25, %v1275_v62 }
 0xe71   :  { %v1469_v54 = vmul.f32 0.5, %v1468_v26 }
 0xe73   :  { %v1470_v39 = vmul.f32 %v1469_v54, %v1288_v0 }
 0xedd   :  { %v1460_v28 = vpop.permute.xlu0 %1459 }
 0xede   :  { %v1462_v30 = vmul.f32 %v1460_v28, %v1456_v25 }
 0xee0   :  { %1464 = vrot.lane.b32.xlu0 %v1462_v30, %s2393_s6 }
 0xee1   :  { %v1473_v31 = vpop.permute.xlu1 %1472 }
 0xee2   :  { %v1475_v33 = vmul.f32 %v1473_v31, %v1469_v54 }
 0xee4   :  { %1477 = vrot.lane.b32.xlu1 %v1475_v33, %s2393_s6 }
 0xf52   :  { %v1465_v35 = vpop.permute.xlu0 %1464 }
 0xf53   :  { %v1467_v37 = vadd.f32 %v1465_v35, %v1457_v29 }
 0xf55   :  { %2342 = vtanh.f32 %v1467_v37 }
 0xf56   :  { %v1478_v41 = vpop.permute.xlu1 %1477 }
 0xf57   :  { %v1480_v27 = vadd.f32 %v1478_v41, %v1470_v39  ;;  %v1992_v39 = vld [vmem:[%s2855_s8] ss:$0 sm:$0xff]  ;;  %s2394_s8 = smov 96  }
 0xf59   :  { %2344 = vtanh.f32 %v1480_v27 }
 0xf62   :  { %v2343_v43 = vpop.eup %2342 }
 0xf63   :  { %1483 = vrot.lane.b32.xlu0 %v2343_v43, %s2393_s6 }
 0xf66   :  { %v2345_v45 = vpop.eup %2344 }
 0xf67   :  { %1489 = vrot.lane.b32.xlu1 %v2345_v45, %s2393_s6 }
 0xfd5   :  { %v1484_v56 = vpop.permute.xlu0 %1483 }
 0xfd6   :  { %v1486_v47 = vmul.f32 %v1484_v56, %v1456_v25 }
 0xfd8   :  { %1494 = vrot.lane.b32.xlu0 %v1486_v47, %s2389_s18 }
 0xfd9   :  { %v1490_v49 = vpop.permute.xlu1 %1489 }
 0xfda   :  { %v1492_v51 = vmul.f32 %v1490_v49, %v1469_v54 }
 0xfdc   :  { %1570 = vrot.lane.b32.xlu1 %v1492_v51, %s2389_s18 }
0x104a   :  { %v1495_v52 = vpop.permute.xlu0 %1494 }
0x104b   :  { %2246 = vmatmul.mubr.msk.f32.vlgmr.msra.gmra.mxu0 %vm78_vm0, %v1495_v52 }
0x104c   :  { %2260 = vmatpush3.msra.mxu0 %v2488_v8  ;;  %2267 = vmatprep.mubr.msk.f32.mxu0 %vm2392_vm2, %v2391_v1 }
0x104d   :  { %2261 = vmatprep.subr.mxu0 %v2391_v1 }
0x104e   :  { %v1571_v53 = vpop.permute.xlu1 %1570  ;;  %2262 = vmatpush3.msra.mxu0 %v2494_v9 }
0x104f   :  { %2257 = vmatmul.mubr.msk.f32.vlgmr.msra.gmra.mxu1 %vm78_vm0, %v1571_v53  ;;  %2263 = vmatprep.subr.mxu0 %v2391_v1 }
0x1050   :  { %2264 = vmatpush3.msra.mxu0 %v2525_v15  ;;  %2271 = vmatpush3.msra.mxu1 %v2499_v10 }
0x1051   :  { %2265 = vmatprep.subr.mxu0 %v2391_v1  ;;  %2272 = vmatprep.subr.mxu1 %v2391_v1 }
0x1052   :  { %2266 = vmatpush3.msra.mxu0 %v2537_v17  ;;  %2273 = vmatpush3.msra.mxu1 %v2530_v16 }
0x1053   :  { %2274 = vmatprep.subr.mxu1 %v2391_v1  ;;  %2278 = vmatprep.mubr.msk.f32.mxu1 %vm2392_vm2, %v2391_v1 }
0x1054   :  { %2275 = vmatpush3.msra.mxu1 %v2542_v18 }
0x1055   :  { %2276 = vmatprep.subr.mxu1 %v2391_v1 }
0x1056   :  { %2277 = vmatpush3.msra.mxu1 %v2551_v19 }
0x110b   :  { %v1564_v8 = vpop.f32.mrf.mxu0 }
0x110c   :  { %v1568_v9 = vadd.f32 %v1564_v8, %v2607_v42 }
0x110d   :  { %v2247_v10 = vpop.f32.mrf.mxu0 }
0x110e   :  { %2346 = vtanh.f32 %v1568_v9 }
0x110f   :  { %v1640_v15 = vpop.f32.mrf.mxu1 }
0x1110   :  { %v1644_v17 = vadd.f32 %v1640_v15, %v2605_v40 }
0x1111   :  { %v2258_v16 = vpop.f32.mrf.mxu1 }
0x1112   :  { %2348 = vtanh.f32 %v1644_v17  ;;  %v1993_v17 = vld [vmem:[#allocation6] ss:$0 sm:$0xff] }
0x111b   :  { %v2347_v55 = vpop.eup %2346 }
0x111c   :  { %1651 = vrot.lane.b32.xlu0 %v2347_v55, %s2393_s6  ;;  %v1647_v18 = vadd.f32 1.0, %v2347_v55 }
0x111e   :  { %v1648_v1 = vmul.f32 0.5, %v1647_v18 }
0x111f   :  { %v2349_v57 = vpop.eup %2348 }
0x1120   :  { %1664 = vrot.lane.b32.xlu1 %v2349_v57, %s2393_s6  ;;  %v1660_v58 = vadd.f32 1.0, %v2349_v57  ;;  %v1649_v40 = vmul.f32 %v1648_v1, %v1467_v37 }
0x1122   :  { %v1661_v42 = vmul.f32 0.5, %v1660_v58 }
0x1124   :  { %v1662_v38 = vmul.f32 %v1661_v42, %v1480_v27 }
0x118e   :  { %v1652_v19 = vpop.permute.xlu0 %1651 }
0x118f   :  { %v1654_v59 = vmul.f32 %v1652_v19, %v1648_v1 }
0x1191   :  { %1656 = vrot.lane.b32.xlu0 %v1654_v59, %s2393_s6 }
0x1192   :  { %v1665_v46 = vpop.permute.xlu1 %1664 }
0x1193   :  { %v1667_v60 = vmul.f32 %v1665_v46, %v1661_v42 }
0x1195   :  { %1669 = vrot.lane.b32.xlu1 %v1667_v60, %s2393_s6 }
0x1203   :  { %v1657_v61 = vpop.permute.xlu0 %1656 }
0x1204   :  { %v1659_v36 = vadd.f32 %v1657_v61, %v1649_v40 }
0x1206   :  { %2350 = vtanh.f32 %v1659_v36 }
0x1207   :  { %v1670_v62 = vpop.permute.xlu1 %1669 }
0x1208   :  { %v1672_v63 = vadd.f32 %v1670_v62, %v1662_v38 }
0x120a   :  { %2352 = vtanh.f32 %v1672_v63 }
0x1213   :  { %v2351_v44 = vpop.eup %2350 }
0x1214   :  { %1675 = vrot.lane.b32.xlu0 %v2351_v44, %s2393_s6 }
0x1217   :  { %v2353_v0 = vpop.eup %2352 }
0x1218   :  { %1681 = vrot.lane.b32.xlu1 %v2353_v0, %s2393_s6 }
0x1286   :  { %v1676_v2 = vpop.permute.xlu0 %1675 }
0x1287   :  { %v1678_v3 = vmul.f32 %v1676_v2, %v1648_v1 }
0x1289   :  { %1686 = vrot.lane.b32.xlu0 %v1678_v3, %s2389_s18 }
0x128a   :  { %v1682_v4 = vpop.permute.xlu1 %1681 }
0x128b   :  { %v1684_v5 = vmul.f32 %v1682_v4, %v1661_v42 }
0x128d   :  { %1762 = vrot.lane.b32.xlu1 %v1684_v5, %s2389_s18 }
0x12fb   :  { %v1687_v6 = vpop.permute.xlu0 %1686 }
0x12fc   :  { %2268 = vmatmul.mubr.msk.f32.vlgmr.msra.gmra.mxu0 %vm78_vm0, %v1687_v6 }
0x12ff   :  { %v1763_v7 = vpop.permute.xlu1 %1762 }
0x1300   :  { %2279 = vmatmul.mubr.msk.f32.vlgmr.msra.gmra.mxu1 %vm78_vm0, %v1763_v7 }
0x13bc   :  { %v1756_v11 = vpop.f32.mrf.mxu0 }
0x13bd   :  { %v1760_v12 = vadd.f32 %v1756_v11, %v2615_v50 }
0x13be   :  { %v2269_v13 = vpop.f32.mrf.mxu0 }
0x13bf   :  { %2354 = vtanh.f32 %v1760_v12 }
0x13c0   :  { %v1832_v14 = vpop.f32.mrf.mxu1 }
0x13c1   :  { %v1836_v34 = vadd.f32 %v1832_v14, %v2597_v32 }
0x13c2   :  { %v2280_v20 = vpop.f32.mrf.mxu1 }
0x13c3   :  { %2356 = vtanh.f32 %v1836_v34 }
0x13cc   :  { %v2355_v21 = vpop.eup %2354 }
0x13cd   :  { %1843 = vrot.lane.b32.xlu0 %v2355_v21, %s2393_s6  ;;  %v1839_v22 = vadd.f32 1.0, %v2355_v21 }
0x13cf   :  { %v1840_v23 = vmul.f32 0.5, %v1839_v22 }
0x13d0   :  { %v2357_v48 = vpop.eup %2356 }
0x13d1   :  { %1856 = vrot.lane.b32.xlu1 %v2357_v48, %s2393_s6  ;;  %v1852_v24 = vadd.f32 1.0, %v2357_v48  ;;  %v1841_v32 = vmul.f32 %v1840_v23, %v1659_v36 }
0x13d3   :  { %v1853_v50 = vmul.f32 0.5, %v1852_v24 }
0x13d5   :  { %v1854_v33 = vmul.f32 %v1853_v50, %v1672_v63 }
0x143f   :  { %v1844_v25 = vpop.permute.xlu0 %1843 }
0x1440   :  { %v1846_v26 = vmul.f32 %v1844_v25, %v1840_v23 }
0x1442   :  { %1848 = vrot.lane.b32.xlu0 %v1846_v26, %s2393_s6 }
0x1443   :  { %v1857_v28 = vpop.permute.xlu1 %1856 }
0x1444   :  { %v1859_v30 = vmul.f32 %v1857_v28, %v1853_v50 }
0x1446   :  { %1861 = vrot.lane.b32.xlu1 %v1859_v30, %s2393_s6 }
0x14b4   :  { %v1849_v54 = vpop.permute.xlu0 %1848 }
0x14b5   :  { %v1851_v31 = vadd.f32 %v1849_v54, %v1841_v32 }
0x14b7   :  { %2358 = vtanh.f32 %v1851_v31 }
0x14b8   :  { %v1862_v29 = vpop.permute.xlu1 %1861 }
0x14b9   :  { %v1864_v35 = vadd.f32 %v1862_v29, %v1854_v33 }
0x14bb   :  { %2360 = vtanh.f32 %v1864_v35 }
0x14c4   :  { %v2359_v37 = vpop.eup %2358 }
0x14c5   :  { %1867 = vrot.lane.b32.xlu0 %v2359_v37, %s2393_s6 }
0x14c8   :  { %v2361_v41 = vpop.eup %2360 }
0x14c9   :  { %1873 = vrot.lane.b32.xlu1 %v2361_v41, %s2393_s6  ;;  %1906 = vrot.lane.b32.xlu0 %v1992_v39, %s2389_s18 }
0x14cd   :  { %1917 = vrot.lane.b32.xlu1 %v1992_v39, %s2393_s6 }
0x1537   :  { %v1868_v27 = vpop.permute.xlu0 %1867 }
0x1538   :  { %v1870_v43 = vmul.f32 %v1868_v27, %v1840_v23 }
0x153b   :  { %v1874_v45 = vpop.permute.xlu1 %1873  ;;  %v1907_v56 = vpop.permute.xlu0 %1906 }
0x153c   :  { %v1909_v47 = vmul.f32 %v1907_v56, %v1870_v43  ;;  %v1876_v49 = vmul.f32 %v1874_v45, %v1853_v50 }
0x153e   :  { %1911 = vrot.lane.b32.xlu0 %v1909_v47, %s2389_s18 }
0x153f   :  { %v1918_v51 = vpop.permute.xlu1 %1917 }
0x1540   :  { %v1920_v52 = vmul.f32 %v1918_v51, %v1876_v49 }
0x1542   :  { %1922 = vrot.lane.b32.xlu1 %v1920_v52, %s2389_s18 }
0x15b0   :  { %v1912_v53 = vpop.permute.xlu0 %1911 }
0x15b1   :  { %v1914_v8 = vsel %vm78_vm0, %v1912_v53, 0.0 }
0x15b2   :  { %1915 = vadd.xlane.f32.xlu0 %v1914_v8 }
0x15b4   :  { %v1923_v9 = vpop.permute.xlu1 %1922 }
0x15b5   :  { %v1925_v10 = vsel %vm78_vm0, %v1923_v9, 0.0 }
0x15b6   :  { %1926 = vadd.xlane.f32.xlu1 %v1925_v10 }
0x15c7   :  { %1883 = vrot.lane.b32.xlu1 %v1876_v49, %s2389_s18 }
0x15c8   :  { %1878 = vrot.lane.b32.xlu0 %v1870_v43, %s2389_s18 }
0x15cb   :  { %1893 = vrot.lane.b32.xlu1 %v1864_v35, %s2394_s8 }
0x15cc   :  { %1888 = vrot.lane.b32.xlu0 %v1851_v31, %s2394_s8 }
0x163b   :  { %v1916_v15 = vpop.xlane.xlu0 %1915 }
0x163f   :  { %v1927_v16 = vpop.xlane.xlu1 %1926  ;;  %v1879_v55 = vpop.permute.xlu0 %1878 }
0x1640   :  { %v1928_v57 = vadd.f32 %v1927_v16, %v1916_v15  ;;  %1881 = vst.msk [vmem:[#allocation2] sm:$0xff] %vm78_vm0, %v1879_v55 }
0x1642   :  { %v1936_v18 = vadd.f32 %v1993_v17, %v1928_v57 }
0x1643   :  { %v1884_v1 = vpop.permute.xlu1 %1883  ;;  %v1889_v58 = vpop.permute.xlu0 %1888 }
0x1644   :  { %v1994_v19 = vmul.f32 -1.442695, %v1936_v18  ;;  %1886 = vst.msk [vmem:[#allocation3] sm:$0xff] %vm78_vm0, %v1884_v1  ;;  %1891 = vst.msk [vmem:[#allocation4] sm:$0xff] %vm78_vm0, %v1889_v58 }
0x1646   :  { %2362 = vpow2.f32 %v1994_v19 }
0x1647   :  { %v1894_v59 = vpop.permute.xlu1 %1893 }
0x1648   :  { %1896 = vst.msk [vmem:[#allocation5] sm:$0xff] %vm78_vm0, %v1894_v59 }
0x1653   :  { %v2363_v42 = vpop.eup %2362 }
0x1654   :  { %v1940_v46 = vadd.f32 1.0, %v2363_v42 }
0x1656   :  { %2364 = vrcp.f32 %v1940_v46 }
0x1663   :  { %v2365_v60 = vpop.eup %2364 }
0x1664   :  { %1944 = vst.msk [vmem:[%s2857_s10] sm:$0xff] %vm1943_vm3, %v2365_v60 }
0x1665   :  { %1949 = vsyncpa [#allocation8], 1 }

</bundles_post_ra>
